<compile_context>
chip_gen: v6e
topology: v6e:2x2x1
jax: 0.10.0
libtpu: 0.0.40
codegen_flags: <defaults>
</compile_context>

<pallas_src>
import functools

import jax
import jax.numpy as jnp
import numpy as np
from jax.experimental import pallas as pl
from jax.experimental.pallas import tpu as pltpu


# ---------------------------------------------------------------------------
# Pallas kernel: bidirectional GRU over the full (small) sequence + fc head.
# Gate math is PyTorch GRU:  r = s(x_r + h_r), z = s(x_z + h_z),
#                            n = tanh(x_n + r*(h_n + b_hn)), h' = (1-z)*n + z*h
# Gate columns: 3 groups of L=128 lanes, each [gate_fwd (H) | gate_bwd (H) | zero pad].
# ---------------------------------------------------------------------------
def encoder_kernel(embc_ref, lens_ref, wih_ref, bih_ref, whh_ref, bhn_ref,
                   wfc_ref, bfc_ref, out_ref, hid_ref, xproj_ref, *, H):
    T, Bp, L = out_ref.shape                     # L = 128 (lane-aligned gate group)
    G = 3 * L

    # ---- hoisted input projection: one big MXU pass over all timesteps -----
    # embc rows: [emb[t] | emb[T-1-t]]; wih is block-diagonal so fwd/bwd columns only
    # see their own embedding half. b_i (+ b_h for r,z) already folded into bih.
    xproj_ref[...] = (
        jnp.dot(embc_ref[...], wih_ref[...], preferred_element_type=jnp.float32)
        + bih_ref[...])

    # ---- hoisted constants (off the recurrence chain) -----------------------
    lens_v = lens_ref[...]                                    # (Bp, L), lens per row
    lane = jax.lax.broadcasted_iota(jnp.int32, (Bp, L), 1)
    fsel = lane < H                                           # fwd lanes 0:H
    bsel = jnp.logical_and(lane >= H, lane < 2 * H)           # bwd lanes H:2H
    fself = fsel.astype(jnp.float32)
    bself = bsel.astype(jnp.float32)
    bhn_b = jnp.broadcast_to(bhn_ref[...], (Bp, L))           # b_hn only (stays inside r*(.))

    hcat = jnp.zeros((Bp, L), jnp.float32)                    # carry [h_fwd | h_bwd | 0]
    fwd_rows = [None] * T
    bwd_rows = [None] * T

    # ---- interleaved fwd/bwd recurrence, fully unrolled (T static & tiny) ---
    for i in range(T):
        gx = xproj_ref[i * Bp:(i + 1) * Bp, :]                # (Bp, 3L) full-tile slice
        # single block-diagonal hidden matmul for all 3 gates of BOTH directions;
        # RHS read from VMEM each step (do not pin ~48 vregs across the loop).
        gh = jnp.dot(hcat, whh_ref[...], preferred_element_type=jnp.float32)

        rz = jax.nn.sigmoid(gx[:, 0:2 * L] + gh[:, 0:2 * L])  # fused r+z EUP pass
        r, z = rz[:, 0:L], rz[:, L:2 * L]                     # clean 128-lane slices
        n = jnp.tanh(gx[:, 2 * L:G] + r * (gh[:, 2 * L:G] + bhn_b))
        hn = (1.0 - z) * n + z * hcat                         # candidate [h_f'|h_b'|0]

        # packed-sequence mask, built in-kernel (fwd step touches t=i, bwd touches t=T-1-i)
        m = jnp.where(fsel, (lens_v > i).astype(jnp.float32),
                      jnp.where(bsel, (lens_v > (T - 1 - i)).astype(jnp.float32), 0.0))
        mhn = m * hn
        hcat = mhn + (1.0 - m) * hcat                         # masked carry (hn finite, safe)

        fwd_rows[i] = mhn * fself                             # fwd output at t=i (0 if padded)
        bwd_rows[T - 1 - i] = hcat * bself                    # bwd output at t=T-1-i

    # ---- single lane-dense output pass: full (8,128)-tile stores, off the chain ----
    for t in range(T):
        out_ref[t] = fwd_rows[t] + bwd_rows[t]

    # ---- hidden = tanh(fc(cat(h_fwd, h_bwd))): one (Bp,L)x(L,HP) dot --------
    hid_ref[...] = jnp.tanh(
        jnp.dot(hcat, wfc_ref[...], preferred_element_type=jnp.float32)
        + bfc_ref[...])


# ---------------------------------------------------------------------------
# ONE-TIME parameter fusion (model-load time, NOT per forward call):
# per-gate/per-direction weights -> block-diagonal, 128-lane-aligned fused weights
# with gate-group layout [r_f r_b 0.. | z_f z_b 0.. | n_f n_b 0..].
# ---------------------------------------------------------------------------
def fuse_encoder_params(p):
    wi_f, wh_f, bi_f, bh_f = p["wi_f"], p["wh_f"], p["bi_f"], p["bh_f"]
    wi_b, wh_b, bi_b, bh_b = p["wi_b"], p["wh_b"], p["bi_b"], p["bh_b"]
    E, H = wi_f.shape[1], wi_f.shape[2]
    Hd = p["wfc_f"].shape[-1]
    L, HP = 128, 128                                   # lane-aligned gate-group / fc widths
    assert 2 * H <= L and Hd <= HP

    wih = jnp.zeros((2 * E, 3 * L), jnp.float32)       # rows: [emb(t) | emb(T-1-t)]
    whh = jnp.zeros((L, 3 * L), jnp.float32)           # rows: [h_f | h_b | pad]
    bih = jnp.zeros((1, 3 * L), jnp.float32)
    for g in range(3):
        c0 = g * L
        wih = wih.at[0:E, c0:c0 + H].set(wi_f[g])
        wih = wih.at[E:2 * E, c0 + H:c0 + 2 * H].set(wi_b[g])
        whh = whh.at[0:H, c0:c0 + H].set(wh_f[g])
        whh = whh.at[H:2 * H, c0 + H:c0 + 2 * H].set(wh_b[g])
        # fold b_i (and b_h for the r/z gates) into the hoisted input projection
        bf = bi_f[g] + (bh_f[g] if g < 2 else 0.0)
        bb = bi_b[g] + (bh_b[g] if g < 2 else 0.0)
        bih = bih.at[:, c0:c0 + H].set(bf)
        bih = bih.at[:, c0 + H:c0 + 2 * H].set(bb)
    bhn = (jnp.zeros((1, L), jnp.float32)
           .at[:, 0:H].set(bh_f[2]).at[:, H:2 * H].set(bh_b[2]))   # stays inside r*( )

    wfc = (jnp.zeros((L, HP), jnp.float32)
           .at[0:H, 0:Hd].set(p["wfc_f"]).at[H:2 * H, 0:Hd].set(p["wfc_b"]))
    bfc = jnp.zeros((1, HP), jnp.float32).at[:, 0:Hd].set(p["bfc"])

    return {
        "embedding": p["embedding"].astype(jnp.float32),
        "wih": wih, "bih": bih, "whh": whh, "bhn": bhn, "wfc": wfc, "bfc": bfc,
        "H": int(H), "Hd": int(Hd), "L": int(L), "HP": int(HP),
    }


# ---------------------------------------------------------------------------
# Per-call wrapper: embedding gather (glue) + batch padding + pallas_call
# ---------------------------------------------------------------------------
def encoder_forward(src, src_len, fused):
    H, Hd, L, HP = fused["H"], fused["Hd"], fused["L"], fused["HP"]
    emb = fused["embedding"][src]                      # (T, B, E) gather = glue
    # nn.Dropout: eval-mode identity (no-op at inference)
    T, B, E = emb.shape
    Bp = ((B + 7) // 8) * 8                            # pad batch to full sublane group

    emb_p = jnp.pad(emb, ((0, 0), (0, Bp - B), (0, 0)))
    # [emb[t] | emb[T-1-t]] rows so fwd+bwd input projections come out of ONE matmul
    embc = jnp.concatenate([emb_p, emb_p[::-1]], axis=-1).reshape(T * Bp, 2 * E)

    # compact per-call mask input: lens broadcast along lanes (pad rows get len 0)
    lens = jnp.pad(src_len.astype(jnp.float32), (0, Bp - B))
    lens_lanes = jnp.broadcast_to(lens[:, None], (Bp, L))

    vmem = pl.BlockSpec(memory_space=pltpu.MemorySpace.VMEM)
    out_p, hid_p = pl.pallas_call(
        functools.partial(encoder_kernel, H=H),
        out_shape=(
            jax.ShapeDtypeStruct((T, Bp, L), jnp.float32),
            jax.ShapeDtypeStruct((Bp, HP), jnp.float32),
        ),
        in_specs=[vmem] * 8,
        out_specs=(vmem, vmem),
        scratch_shapes=[pltpu.VMEM((T * Bp, 3 * L), jnp.float32)],
    )(embc, lens_lanes, fused["wih"], fused["bih"], fused["whh"],
      fused["bhn"], fused["wfc"], fused["bfc"])

    # slice back to the unpadded module-facing shapes
    return out_p[:, :B, :2 * H], hid_p[:B, :Hd]


# ---------------------------------------------------------------------------
# Pure-JAX reference (unfused, per-gate masked-GRU math) for validation.
# ---------------------------------------------------------------------------
def reference_forward(src, src_len, p):
    emb = p["embedding"][src].astype(jnp.float32)
    T, B, _ = emb.shape
    H = p["wh_f"].shape[-1]

    def cell(x, h, wi, wh, bi, bh):
        r = jax.nn.sigmoid(x @ wi[0] + bi[0] + h @ wh[0] + bh[0])
        z = jax.nn.sigmoid(x @ wi[1] + bi[1] + h @ wh[1] + bh[1])
        n = jnp.tanh(x @ wi[2] + bi[2] + r * (h @ wh[2] + bh[2]))
        return (1.0 - z) * n + z * h

    lens = src_len.reshape(B, 1)
    h = jnp.zeros((B, H), jnp.float32)
    outs_f = []
    for t in range(T):
        hn = cell(emb[t], h, p["wi_f"], p["wh_f"], p["bi_f"], p["bh_f"])
        m = t < lens
        h = jnp.where(m, hn, h)
        outs_f.append(jnp.where(m, hn, 0.0))
    h_f = h

    h = jnp.zeros((B, H), jnp.float32)
    outs_b = [None] * T
    for t in range(T - 1, -1, -1):
        hn = cell(emb[t], h, p["wi_b"], p["wh_b"], p["bi_b"], p["bh_b"])
        m = t < lens
        h = jnp.where(m, hn, h)
        outs_b[t] = h
    h_b = h

    outputs = jnp.concatenate([jnp.stack(outs_f), jnp.stack(outs_b)], axis=-1)
    hidden = jnp.tanh(h_f @ p["wfc_f"] + h_b @ p["wfc_b"] + p["bfc"])
    return outputs, hidden


# ---------------------------------------------------------------------------
# Deterministic parameter init (shapes from the module's __init__)
# ---------------------------------------------------------------------------
def init_params(key, vocab_size, emb_dim, enc_hid, dec_hid):
    ks = jax.random.split(key, 16)
    s = 0.1

    def rnd(k, shape):
        return (s * jax.random.normal(k, shape)).astype(jnp.float32)

    return {
        "embedding": rnd(ks[0], (vocab_size, emb_dim)),    # Embedding.from_pretrained
        # forward-direction GRU (weights stored transposed, per-gate [r,z,n])
        "wi_f": rnd(ks[1], (3, emb_dim, enc_hid)),
        "wh_f": rnd(ks[2], (3, enc_hid, enc_hid)),
        "bi_f": rnd(ks[3], (3, 1, enc_hid)),
        "bh_f": rnd(ks[4], (3, 1, enc_hid)),
        # backward-direction GRU
        "wi_b": rnd(ks[5], (3, emb_dim, enc_hid)),
        "wh_b": rnd(ks[6], (3, enc_hid, enc_hid)),
        "bi_b": rnd(ks[7], (3, 1, enc_hid)),
        "bh_b": rnd(ks[8], (3, 1, enc_hid)),
        # fc: Linear(2*enc_hid, dec_hid); split along the concat axis
        "wfc_f": rnd(ks[9], (enc_hid, dec_hid)),
        "wfc_b": rnd(ks[10], (enc_hid, dec_hid)),
        "bfc": rnd(ks[11], (1, dec_hid)),
    }


if __name__ == "__main__":
    # small sizes: vocab=50, emb=32, enc_hid=32, dec_hid=32, seq T=8, batch B=4
    VOCAB, EMB, ENC_H, DEC_H = 50, 32, 32, 32
    T, B = 8, 4

    key = jax.random.PRNGKey(0)
    kp, ks = jax.random.split(key)
    params = init_params(kp, VOCAB, EMB, ENC_H, DEC_H)

    # one-time weight fusion (model-load time, hoisted out of the per-call path)
    fused = fuse_encoder_params(params)
    fused = jax.tree_util.tree_map(
        lambda x: jax.block_until_ready(x) if isinstance(x, jax.Array) else x, fused)

    src = jax.random.randint(ks, (T, B), 0, VOCAB, dtype=jnp.int32)
    # max(src_len) == T so pad_packed_sequence would return full length T
    src_len = jnp.array([T, 5, 3, 6], dtype=jnp.int32)

    outputs, hidden = encoder_forward(src, src_len, fused)
    jax.block_until_ready((outputs, hidden))

    ref_out, ref_hid = reference_forward(src, src_len, params)
    assert outputs.shape == (T, B, 2 * ENC_H) and hidden.shape == (B, DEC_H)
    np.testing.assert_allclose(np.asarray(outputs), np.asarray(ref_out), atol=1e-5, rtol=1e-5)
    np.testing.assert_allclose(np.asarray(hidden), np.asarray(ref_hid), atol=1e-5, rtol=1e-5)

    print("KERNEL_OK")
</pallas_src>

<mosaic_0001>
module attributes {stable_mosaic.version = 11 : i64} {
  func.func @encoder_kernel(%arg0: memref<64x64xf32, #tpu.memory_space<vmem>>, %arg1: memref<8x128xf32, #tpu.memory_space<vmem>>, %arg2: memref<64x384xf32, #tpu.memory_space<vmem>>, %arg3: memref<1x384xf32, #tpu.memory_space<vmem>>, %arg4: memref<128x384xf32, #tpu.memory_space<vmem>>, %arg5: memref<1x128xf32, #tpu.memory_space<vmem>>, %arg6: memref<128x128xf32, #tpu.memory_space<vmem>>, %arg7: memref<1x128xf32, #tpu.memory_space<vmem>>, %arg8: memref<8x8x128xf32, #tpu.memory_space<vmem>>, %arg9: memref<8x128xf32, #tpu.memory_space<vmem>>, %arg10: memref<64x384xf32, #tpu.memory_space<vmem>>) attributes {dimension_semantics = [], scalar_prefetch = 0 : i64, scratch_operands = 1 : i64, tpu.core_type = #tpu.core_type<tc>} {
    %c0 = arith.constant 0 : index
    %c0_0 = arith.constant 0 : index
    %0 = vector.load %arg0[%c0, %c0_0] : memref<64x64xf32, #tpu.memory_space<vmem>>, vector<64x64xf32>
    %c0_1 = arith.constant 0 : index
    %c0_2 = arith.constant 0 : index
    %1 = vector.load %arg2[%c0_1, %c0_2] : memref<64x384xf32, #tpu.memory_space<vmem>>, vector<64x384xf32>
    %cst = arith.constant dense<0.000000e+00> : vector<64x384xf32>
    %2 = tpu.matmul %0, %1, %cst {dimension_numbers = #tpu.dot_dimension_numbers<[1], [0], [0], [1], [0, 0, 1, 1], [], []>} : vector<64x64xf32>, vector<64x384xf32>, vector<64x384xf32> -> vector<64x384xf32>
    %c0_3 = arith.constant 0 : index
    %c0_4 = arith.constant 0 : index
    %3 = vector.load %arg3[%c0_3, %c0_4] : memref<1x384xf32, #tpu.memory_space<vmem>>, vector<1x384xf32>
    %4 = vector.broadcast %3 : vector<1x384xf32> to vector<64x384xf32>
    %5 = arith.addf %2, %4 : vector<64x384xf32>
    %c0_5 = arith.constant 0 : index
    %c0_6 = arith.constant 0 : index
    %6 = vector.load %arg10[%c0_5, %c0_6] : memref<64x384xf32, #tpu.memory_space<vmem>>, vector<64x384xf32>
    tpu.vector_store %arg10[%c0_5, %c0_6], %5 {strides = array<i32>} : memref<64x384xf32, #tpu.memory_space<vmem>>, vector<64x384xf32>,
    %c0_7 = arith.constant 0 : index
    %c0_8 = arith.constant 0 : index
    %7 = vector.load %arg1[%c0_7, %c0_8] : memref<8x128xf32, #tpu.memory_space<vmem>>, vector<8x128xf32>
    %8 = tpu.iota {dimensions = array<i32: 1>} : vector<8x128xi32>
    %c32_i32 = arith.constant 32 : i32
    %9 = vector.broadcast %c32_i32 : i32 to vector<8x128xi32>
    %10 = arith.cmpi slt, %8, %9 : vector<8x128xi32>
    %c32_i32_9 = arith.constant 32 : i32
    %11 = vector.broadcast %c32_i32_9 : i32 to vector<8x128xi32>
    %12 = arith.cmpi sge, %8, %11 : vector<8x128xi32>
    %c64_i32 = arith.constant 64 : i32
    %13 = vector.broadcast %c64_i32 : i32 to vector<8x128xi32>
    %14 = arith.cmpi slt, %8, %13 : vector<8x128xi32>
    %15 = arith.andi %12, %14 : vector<8x128xi1>
    %16 = arith.extui %10 : vector<8x128xi1> to vector<8x128xi32>
    %17 = arith.sitofp %16 : vector<8x128xi32> to vector<8x128xf32>
    %18 = arith.extui %15 : vector<8x128xi1> to vector<8x128xi32>
    %19 = arith.sitofp %18 : vector<8x128xi32> to vector<8x128xf32>
    %c0_10 = arith.constant 0 : index
    %c0_11 = arith.constant 0 : index
    %20 = vector.load %arg5[%c0_10, %c0_11] : memref<1x128xf32, #tpu.memory_space<vmem>>, vector<1x128xf32>
    %21 = vector.shape_cast %20 : vector<1x128xf32> to vector<1x128xf32>
    %22 = vector.broadcast %21 : vector<1x128xf32> to vector<8x128xf32>
    %cst_12 = arith.constant 0.000000e+00 : f32
    %23 = vector.broadcast %cst_12 : f32 to vector<8x128xf32>
    %c0_13 = arith.constant 0 : index
    %c0_14 = arith.constant 0 : index
    %24 = vector.load %arg10[%c0_13, %c0_14] : memref<64x384xf32, #tpu.memory_space<vmem>>, vector<8x384xf32>
    %c0_15 = arith.constant 0 : index
    %c0_16 = arith.constant 0 : index
    %25 = vector.load %arg4[%c0_15, %c0_16] : memref<128x384xf32, #tpu.memory_space<vmem>>, vector<128x384xf32>
    %cst_17 = arith.constant dense<0.000000e+00> : vector<8x384xf32>
    %26 = tpu.matmul %23, %25, %cst_17 {dimension_numbers = #tpu.dot_dimension_numbers<[1], [0], [0], [1], [0, 0, 1, 1], [], []>} : vector<8x128xf32>, vector<128x384xf32>, vector<8x384xf32> -> vector<8x384xf32>
    %27 = vector.extract_strided_slice %24 {offsets = [0, 0], sizes = [8, 256], strides = [1, 1]} : vector<8x384xf32> to vector<8x256xf32>
    %28 = vector.extract_strided_slice %26 {offsets = [0, 0], sizes = [8, 256], strides = [1, 1]} : vector<8x384xf32> to vector<8x256xf32>
    %29 = arith.addf %27, %28 : vector<8x256xf32>
    %30 = arith.negf %29 : vector<8x256xf32>
    %31 = math.exp %30 : vector<8x256xf32>
    %cst_18 = arith.constant 1.000000e+00 : f32
    %32 = vector.broadcast %cst_18 : f32 to vector<8x256xf32>
    %33 = arith.addf %32, %31 : vector<8x256xf32>
    %34 = arith.divf %32, %33 : vector<8x256xf32>
    %35 = vector.extract_strided_slice %34 {offsets = [0, 0], sizes = [8, 128], strides = [1, 1]} : vector<8x256xf32> to vector<8x128xf32>
    %36 = vector.extract_strided_slice %34 {offsets = [0, 128], sizes = [8, 128], strides = [1, 1]} : vector<8x256xf32> to vector<8x128xf32>
    %37 = vector.extract_strided_slice %24 {offsets = [0, 256], sizes = [8, 128], strides = [1, 1]} : vector<8x384xf32> to vector<8x128xf32>
    %38 = vector.extract_strided_slice %26 {offsets = [0, 256], sizes = [8, 128], strides = [1, 1]} : vector<8x384xf32> to vector<8x128xf32>
    %39 = arith.addf %38, %22 : vector<8x128xf32>
    %40 = arith.mulf %35, %39 : vector<8x128xf32>
    %41 = arith.addf %37, %40 : vector<8x128xf32>
    %42 = math.tanh %41 : vector<8x128xf32>
    %cst_19 = arith.constant 1.000000e+00 : f32
    %43 = vector.broadcast %cst_19 : f32 to vector<8x128xf32>
    %44 = arith.subf %43, %36 : vector<8x128xf32>
    %45 = arith.mulf %44, %42 : vector<8x128xf32>
    %46 = arith.mulf %36, %23 : vector<8x128xf32>
    %47 = arith.addf %45, %46 : vector<8x128xf32>
    %cst_20 = arith.constant 0.000000e+00 : f32
    %48 = vector.broadcast %cst_20 : f32 to vector<8x128xf32>
    %49 = arith.cmpf ogt, %7, %48 : vector<8x128xf32>
    %50 = arith.extui %49 : vector<8x128xi1> to vector<8x128xi32>
    %51 = arith.sitofp %50 : vector<8x128xi32> to vector<8x128xf32>
    %cst_21 = arith.constant 7.000000e+00 : f32
    %52 = vector.broadcast %cst_21 : f32 to vector<8x128xf32>
    %53 = arith.cmpf ogt, %7, %52 : vector<8x128xf32>
    %54 = arith.extui %53 : vector<8x128xi1> to vector<8x128xi32>
    %55 = arith.sitofp %54 : vector<8x128xi32> to vector<8x128xf32>
    %cst_22 = arith.constant 0.000000e+00 : f32
    %56 = vector.broadcast %cst_22 : f32 to vector<8x128xf32>
    %57 = arith.select %15, %55, %56 : vector<8x128xi1>, vector<8x128xf32>
    %58 = arith.select %10, %51, %57 : vector<8x128xi1>, vector<8x128xf32>
    %59 = arith.mulf %58, %47 : vector<8x128xf32>
    %cst_23 = arith.constant 1.000000e+00 : f32
    %60 = vector.broadcast %cst_23 : f32 to vector<8x128xf32>
    %61 = arith.subf %60, %58 : vector<8x128xf32>
    %62 = arith.mulf %61, %23 : vector<8x128xf32>
    %63 = arith.addf %59, %62 : vector<8x128xf32>
    %64 = arith.mulf %59, %17 : vector<8x128xf32>
    %65 = arith.mulf %63, %19 : vector<8x128xf32>
    %c8 = arith.constant 8 : index
    %c0_24 = arith.constant 0 : index
    %66 = vector.load %arg10[%c8, %c0_24] : memref<64x384xf32, #tpu.memory_space<vmem>>, vector<8x384xf32>
    %c0_25 = arith.constant 0 : index
    %c0_26 = arith.constant 0 : index
    %67 = vector.load %arg4[%c0_25, %c0_26] : memref<128x384xf32, #tpu.memory_space<vmem>>, vector<128x384xf32>
    %cst_27 = arith.constant dense<0.000000e+00> : vector<8x384xf32>
    %68 = tpu.matmul %63, %67, %cst_27 {dimension_numbers = #tpu.dot_dimension_numbers<[1], [0], [0], [1], [0, 0, 1, 1], [], []>} : vector<8x128xf32>, vector<128x384xf32>, vector<8x384xf32> -> vector<8x384xf32>
    %69 = vector.extract_strided_slice %66 {offsets = [0, 0], sizes = [8, 256], strides = [1, 1]} : vector<8x384xf32> to vector<8x256xf32>
    %70 = vector.extract_strided_slice %68 {offsets = [0, 0], sizes = [8, 256], strides = [1, 1]} : vector<8x384xf32> to vector<8x256xf32>
    %71 = arith.addf %69, %70 : vector<8x256xf32>
    %72 = arith.negf %71 : vector<8x256xf32>
    %73 = math.exp %72 : vector<8x256xf32>
    %cst_28 = arith.constant 1.000000e+00 : f32
    %74 = vector.broadcast %cst_28 : f32 to vector<8x256xf32>
    %75 = arith.addf %74, %73 : vector<8x256xf32>
    %76 = arith.divf %74, %75 : vector<8x256xf32>
    %77 = vector.extract_strided_slice %76 {offsets = [0, 0], sizes = [8, 128], strides = [1, 1]} : vector<8x256xf32> to vector<8x128xf32>
    %78 = vector.extract_strided_slice %76 {offsets = [0, 128], sizes = [8, 128], strides = [1, 1]} : vector<8x256xf32> to vector<8x128xf32>
    %79 = vector.extract_strided_slice %66 {offsets = [0, 256], sizes = [8, 128], strides = [1, 1]} : vector<8x384xf32> to vector<8x128xf32>
    %80 = vector.extract_strided_slice %68 {offsets = [0, 256], sizes = [8, 128], strides = [1, 1]} : vector<8x384xf32> to vector<8x128xf32>
    %81 = arith.addf %80, %22 : vector<8x128xf32>
    %82 = arith.mulf %77, %81 : vector<8x128xf32>
    %83 = arith.addf %79, %82 : vector<8x128xf32>
    %84 = math.tanh %83 : vector<8x128xf32>
    %cst_29 = arith.constant 1.000000e+00 : f32
    %85 = vector.broadcast %cst_29 : f32 to vector<8x128xf32>
    %86 = arith.subf %85, %78 : vector<8x128xf32>
    %87 = arith.mulf %86, %84 : vector<8x128xf32>
    %88 = arith.mulf %78, %63 : vector<8x128xf32>
    %89 = arith.addf %87, %88 : vector<8x128xf32>
    %cst_30 = arith.constant 1.000000e+00 : f32
    %90 = vector.broadcast %cst_30 : f32 to vector<8x128xf32>
    %91 = arith.cmpf ogt, %7, %90 : vector<8x128xf32>
    %92 = arith.extui %91 : vector<8x128xi1> to vector<8x128xi32>
    %93 = arith.sitofp %92 : vector<8x128xi32> to vector<8x128xf32>
    %cst_31 = arith.constant 6.000000e+00 : f32
    %94 = vector.broadcast %cst_31 : f32 to vector<8x128xf32>
    %95 = arith.cmpf ogt, %7, %94 : vector<8x128xf32>
    %96 = arith.extui %95 : vector<8x128xi1> to vector<8x128xi32>
    %97 = arith.sitofp %96 : vector<8x128xi32> to vector<8x128xf32>
    %cst_32 = arith.constant 0.000000e+00 : f32
    %98 = vector.broadcast %cst_32 : f32 to vector<8x128xf32>
    %99 = arith.select %15, %97, %98 : vector<8x128xi1>, vector<8x128xf32>
    %100 = arith.select %10, %93, %99 : vector<8x128xi1>, vector<8x128xf32>
    %101 = arith.mulf %100, %89 : vector<8x128xf32>
    %cst_33 = arith.constant 1.000000e+00 : f32
    %102 = vector.broadcast %cst_33 : f32 to vector<8x128xf32>
    %103 = arith.subf %102, %100 : vector<8x128xf32>
    %104 = arith.mulf %103, %63 : vector<8x128xf32>
    %105 = arith.addf %101, %104 : vector<8x128xf32>
    %106 = arith.mulf %101, %17 : vector<8x128xf32>
    %107 = arith.mulf %105, %19 : vector<8x128xf32>
    %c16 = arith.constant 16 : index
    %c0_34 = arith.constant 0 : index
    %108 = vector.load %arg10[%c16, %c0_34] : memref<64x384xf32, #tpu.memory_space<vmem>>, vector<8x384xf32>
    %c0_35 = arith.constant 0 : index
    %c0_36 = arith.constant 0 : index
    %109 = vector.load %arg4[%c0_35, %c0_36] : memref<128x384xf32, #tpu.memory_space<vmem>>, vector<128x384xf32>
    %cst_37 = arith.constant dense<0.000000e+00> : vector<8x384xf32>
    %110 = tpu.matmul %105, %109, %cst_37 {dimension_numbers = #tpu.dot_dimension_numbers<[1], [0], [0], [1], [0, 0, 1, 1], [], []>} : vector<8x128xf32>, vector<128x384xf32>, vector<8x384xf32> -> vector<8x384xf32>
    %111 = vector.extract_strided_slice %108 {offsets = [0, 0], sizes = [8, 256], strides = [1, 1]} : vector<8x384xf32> to vector<8x256xf32>
    %112 = vector.extract_strided_slice %110 {offsets = [0, 0], sizes = [8, 256], strides = [1, 1]} : vector<8x384xf32> to vector<8x256xf32>
    %113 = arith.addf %111, %112 : vector<8x256xf32>
    %114 = arith.negf %113 : vector<8x256xf32>
    %115 = math.exp %114 : vector<8x256xf32>
    %cst_38 = arith.constant 1.000000e+00 : f32
    %116 = vector.broadcast %cst_38 : f32 to vector<8x256xf32>
    %117 = arith.addf %116, %115 : vector<8x256xf32>
    %118 = arith.divf %116, %117 : vector<8x256xf32>
    %119 = vector.extract_strided_slice %118 {offsets = [0, 0], sizes = [8, 128], strides = [1, 1]} : vector<8x256xf32> to vector<8x128xf32>
    %120 = vector.extract_strided_slice %118 {offsets = [0, 128], sizes = [8, 128], strides = [1, 1]} : vector<8x256xf32> to vector<8x128xf32>
    %121 = vector.extract_strided_slice %108 {offsets = [0, 256], sizes = [8, 128], strides = [1, 1]} : vector<8x384xf32> to vector<8x128xf32>
    %122 = vector.extract_strided_slice %110 {offsets = [0, 256], sizes = [8, 128], strides = [1, 1]} : vector<8x384xf32> to vector<8x128xf32>
    %123 = arith.addf %122, %22 : vector<8x128xf32>
    %124 = arith.mulf %119, %123 : vector<8x128xf32>
    %125 = arith.addf %121, %124 : vector<8x128xf32>
    %126 = math.tanh %125 : vector<8x128xf32>
    %cst_39 = arith.constant 1.000000e+00 : f32
    %127 = vector.broadcast %cst_39 : f32 to vector<8x128xf32>
    %128 = arith.subf %127, %120 : vector<8x128xf32>
    %129 = arith.mulf %128, %126 : vector<8x128xf32>
    %130 = arith.mulf %120, %105 : vector<8x128xf32>
    %131 = arith.addf %129, %130 : vector<8x128xf32>
    %cst_40 = arith.constant 2.000000e+00 : f32
    %132 = vector.broadcast %cst_40 : f32 to vector<8x128xf32>
    %133 = arith.cmpf ogt, %7, %132 : vector<8x128xf32>
    %134 = arith.extui %133 : vector<8x128xi1> to vector<8x128xi32>
    %135 = arith.sitofp %134 : vector<8x128xi32> to vector<8x128xf32>
    %cst_41 = arith.constant 5.000000e+00 : f32
    %136 = vector.broadcast %cst_41 : f32 to vector<8x128xf32>
    %137 = arith.cmpf ogt, %7, %136 : vector<8x128xf32>
    %138 = arith.extui %137 : vector<8x128xi1> to vector<8x128xi32>
    %139 = arith.sitofp %138 : vector<8x128xi32> to vector<8x128xf32>
    %cst_42 = arith.constant 0.000000e+00 : f32
    %140 = vector.broadcast %cst_42 : f32 to vector<8x128xf32>
    %141 = arith.select %15, %139, %140 : vector<8x128xi1>, vector<8x128xf32>
    %142 = arith.select %10, %135, %141 : vector<8x128xi1>, vector<8x128xf32>
    %143 = arith.mulf %142, %131 : vector<8x128xf32>
    %cst_43 = arith.constant 1.000000e+00 : f32
    %144 = vector.broadcast %cst_43 : f32 to vector<8x128xf32>
    %145 = arith.subf %144, %142 : vector<8x128xf32>
    %146 = arith.mulf %145, %105 : vector<8x128xf32>
    %147 = arith.addf %143, %146 : vector<8x128xf32>
    %148 = arith.mulf %143, %17 : vector<8x128xf32>
    %149 = arith.mulf %147, %19 : vector<8x128xf32>
    %c24 = arith.constant 24 : index
    %c0_44 = arith.constant 0 : index
    %150 = vector.load %arg10[%c24, %c0_44] : memref<64x384xf32, #tpu.memory_space<vmem>>, vector<8x384xf32>
    %c0_45 = arith.constant 0 : index
    %c0_46 = arith.constant 0 : index
    %151 = vector.load %arg4[%c0_45, %c0_46] : memref<128x384xf32, #tpu.memory_space<vmem>>, vector<128x384xf32>
    %cst_47 = arith.constant dense<0.000000e+00> : vector<8x384xf32>
    %152 = tpu.matmul %147, %151, %cst_47 {dimension_numbers = #tpu.dot_dimension_numbers<[1], [0], [0], [1], [0, 0, 1, 1], [], []>} : vector<8x128xf32>, vector<128x384xf32>, vector<8x384xf32> -> vector<8x384xf32>
    %153 = vector.extract_strided_slice %150 {offsets = [0, 0], sizes = [8, 256], strides = [1, 1]} : vector<8x384xf32> to vector<8x256xf32>
    %154 = vector.extract_strided_slice %152 {offsets = [0, 0], sizes = [8, 256], strides = [1, 1]} : vector<8x384xf32> to vector<8x256xf32>
    %155 = arith.addf %153, %154 : vector<8x256xf32>
    %156 = arith.negf %155 : vector<8x256xf32>
    %157 = math.exp %156 : vector<8x256xf32>
    %cst_48 = arith.constant 1.000000e+00 : f32
    %158 = vector.broadcast %cst_48 : f32 to vector<8x256xf32>
    %159 = arith.addf %158, %157 : vector<8x256xf32>
    %160 = arith.divf %158, %159 : vector<8x256xf32>
    %161 = vector.extract_strided_slice %160 {offsets = [0, 0], sizes = [8, 128], strides = [1, 1]} : vector<8x256xf32> to vector<8x128xf32>
    %162 = vector.extract_strided_slice %160 {offsets = [0, 128], sizes = [8, 128], strides = [1, 1]} : vector<8x256xf32> to vector<8x128xf32>
    %163 = vector.extract_strided_slice %150 {offsets = [0, 256], sizes = [8, 128], strides = [1, 1]} : vector<8x384xf32> to vector<8x128xf32>
    %164 = vector.extract_strided_slice %152 {offsets = [0, 256], sizes = [8, 128], strides = [1, 1]} : vector<8x384xf32> to vector<8x128xf32>
    %165 = arith.addf %164, %22 : vector<8x128xf32>
    %166 = arith.mulf %161, %165 : vector<8x128xf32>
    %167 = arith.addf %163, %166 : vector<8x128xf32>
    %168 = math.tanh %167 : vector<8x128xf32>
    %cst_49 = arith.constant 1.000000e+00 : f32
    %169 = vector.broadcast %cst_49 : f32 to vector<8x128xf32>
    %170 = arith.subf %169, %162 : vector<8x128xf32>
    %171 = arith.mulf %170, %168 : vector<8x128xf32>
    %172 = arith.mulf %162, %147 : vector<8x128xf32>
    %173 = arith.addf %171, %172 : vector<8x128xf32>
    %cst_50 = arith.constant 3.000000e+00 : f32
    %174 = vector.broadcast %cst_50 : f32 to vector<8x128xf32>
    %175 = arith.cmpf ogt, %7, %174 : vector<8x128xf32>
    %176 = arith.extui %175 : vector<8x128xi1> to vector<8x128xi32>
    %177 = arith.sitofp %176 : vector<8x128xi32> to vector<8x128xf32>
    %cst_51 = arith.constant 4.000000e+00 : f32
    %178 = vector.broadcast %cst_51 : f32 to vector<8x128xf32>
    %179 = arith.cmpf ogt, %7, %178 : vector<8x128xf32>
    %180 = arith.extui %179 : vector<8x128xi1> to vector<8x128xi32>
    %181 = arith.sitofp %180 : vector<8x128xi32> to vector<8x128xf32>
    %cst_52 = arith.constant 0.000000e+00 : f32
    %182 = vector.broadcast %cst_52 : f32 to vector<8x128xf32>
    %183 = arith.select %15, %181, %182 : vector<8x128xi1>, vector<8x128xf32>
    %184 = arith.select %10, %177, %183 : vector<8x128xi1>, vector<8x128xf32>
    %185 = arith.mulf %184, %173 : vector<8x128xf32>
    %cst_53 = arith.constant 1.000000e+00 : f32
    %186 = vector.broadcast %cst_53 : f32 to vector<8x128xf32>
    %187 = arith.subf %186, %184 : vector<8x128xf32>
    %188 = arith.mulf %187, %147 : vector<8x128xf32>
    %189 = arith.addf %185, %188 : vector<8x128xf32>
    %190 = arith.mulf %185, %17 : vector<8x128xf32>
    %191 = arith.mulf %189, %19 : vector<8x128xf32>
    %c32 = arith.constant 32 : index
    %c0_54 = arith.constant 0 : index
    %192 = vector.load %arg10[%c32, %c0_54] : memref<64x384xf32, #tpu.memory_space<vmem>>, vector<8x384xf32>
    %c0_55 = arith.constant 0 : index
    %c0_56 = arith.constant 0 : index
    %193 = vector.load %arg4[%c0_55, %c0_56] : memref<128x384xf32, #tpu.memory_space<vmem>>, vector<128x384xf32>
    %cst_57 = arith.constant dense<0.000000e+00> : vector<8x384xf32>
    %194 = tpu.matmul %189, %193, %cst_57 {dimension_numbers = #tpu.dot_dimension_numbers<[1], [0], [0], [1], [0, 0, 1, 1], [], []>} : vector<8x128xf32>, vector<128x384xf32>, vector<8x384xf32> -> vector<8x384xf32>
    %195 = vector.extract_strided_slice %192 {offsets = [0, 0], sizes = [8, 256], strides = [1, 1]} : vector<8x384xf32> to vector<8x256xf32>
    %196 = vector.extract_strided_slice %194 {offsets = [0, 0], sizes = [8, 256], strides = [1, 1]} : vector<8x384xf32> to vector<8x256xf32>
    %197 = arith.addf %195, %196 : vector<8x256xf32>
    %198 = arith.negf %197 : vector<8x256xf32>
    %199 = math.exp %198 : vector<8x256xf32>
    %cst_58 = arith.constant 1.000000e+00 : f32
    %200 = vector.broadcast %cst_58 : f32 to vector<8x256xf32>
    %201 = arith.addf %200, %199 : vector<8x256xf32>
    %202 = arith.divf %200, %201 : vector<8x256xf32>
    %203 = vector.extract_strided_slice %202 {offsets = [0, 0], sizes = [8, 128], strides = [1, 1]} : vector<8x256xf32> to vector<8x128xf32>
    %204 = vector.extract_strided_slice %202 {offsets = [0, 128], sizes = [8, 128], strides = [1, 1]} : vector<8x256xf32> to vector<8x128xf32>
    %205 = vector.extract_strided_slice %192 {offsets = [0, 256], sizes = [8, 128], strides = [1, 1]} : vector<8x384xf32> to vector<8x128xf32>
    %206 = vector.extract_strided_slice %194 {offsets = [0, 256], sizes = [8, 128], strides = [1, 1]} : vector<8x384xf32> to vector<8x128xf32>
    %207 = arith.addf %206, %22 : vector<8x128xf32>
    %208 = arith.mulf %203, %207 : vector<8x128xf32>
    %209 = arith.addf %205, %208 : vector<8x128xf32>
    %210 = math.tanh %209 : vector<8x128xf32>
    %cst_59 = arith.constant 1.000000e+00 : f32
    %211 = vector.broadcast %cst_59 : f32 to vector<8x128xf32>
    %212 = arith.subf %211, %204 : vector<8x128xf32>
    %213 = arith.mulf %212, %210 : vector<8x128xf32>
    %214 = arith.mulf %204, %189 : vector<8x128xf32>
    %215 = arith.addf %213, %214 : vector<8x128xf32>
    %cst_60 = arith.constant 4.000000e+00 : f32
    %216 = vector.broadcast %cst_60 : f32 to vector<8x128xf32>
    %217 = arith.cmpf ogt, %7, %216 : vector<8x128xf32>
    %218 = arith.extui %217 : vector<8x128xi1> to vector<8x128xi32>
    %219 = arith.sitofp %218 : vector<8x128xi32> to vector<8x128xf32>
    %cst_61 = arith.constant 3.000000e+00 : f32
    %220 = vector.broadcast %cst_61 : f32 to vector<8x128xf32>
    %221 = arith.cmpf ogt, %7, %220 : vector<8x128xf32>
    %222 = arith.extui %221 : vector<8x128xi1> to vector<8x128xi32>
    %223 = arith.sitofp %222 : vector<8x128xi32> to vector<8x128xf32>
    %cst_62 = arith.constant 0.000000e+00 : f32
    %224 = vector.broadcast %cst_62 : f32 to vector<8x128xf32>
    %225 = arith.select %15, %223, %224 : vector<8x128xi1>, vector<8x128xf32>
    %226 = arith.select %10, %219, %225 : vector<8x128xi1>, vector<8x128xf32>
    %227 = arith.mulf %226, %215 : vector<8x128xf32>
    %cst_63 = arith.constant 1.000000e+00 : f32
    %228 = vector.broadcast %cst_63 : f32 to vector<8x128xf32>
    %229 = arith.subf %228, %226 : vector<8x128xf32>
    %230 = arith.mulf %229, %189 : vector<8x128xf32>
    %231 = arith.addf %227, %230 : vector<8x128xf32>
    %232 = arith.mulf %227, %17 : vector<8x128xf32>
    %233 = arith.mulf %231, %19 : vector<8x128xf32>
    %c40 = arith.constant 40 : index
    %c0_64 = arith.constant 0 : index
    %234 = vector.load %arg10[%c40, %c0_64] : memref<64x384xf32, #tpu.memory_space<vmem>>, vector<8x384xf32>
    %c0_65 = arith.constant 0 : index
    %c0_66 = arith.constant 0 : index
    %235 = vector.load %arg4[%c0_65, %c0_66] : memref<128x384xf32, #tpu.memory_space<vmem>>, vector<128x384xf32>
    %cst_67 = arith.constant dense<0.000000e+00> : vector<8x384xf32>
    %236 = tpu.matmul %231, %235, %cst_67 {dimension_numbers = #tpu.dot_dimension_numbers<[1], [0], [0], [1], [0, 0, 1, 1], [], []>} : vector<8x128xf32>, vector<128x384xf32>, vector<8x384xf32> -> vector<8x384xf32>
    %237 = vector.extract_strided_slice %234 {offsets = [0, 0], sizes = [8, 256], strides = [1, 1]} : vector<8x384xf32> to vector<8x256xf32>
    %238 = vector.extract_strided_slice %236 {offsets = [0, 0], sizes = [8, 256], strides = [1, 1]} : vector<8x384xf32> to vector<8x256xf32>
    %239 = arith.addf %237, %238 : vector<8x256xf32>
    %240 = arith.negf %239 : vector<8x256xf32>
    %241 = math.exp %240 : vector<8x256xf32>
    %cst_68 = arith.constant 1.000000e+00 : f32
    %242 = vector.broadcast %cst_68 : f32 to vector<8x256xf32>
    %243 = arith.addf %242, %241 : vector<8x256xf32>
    %244 = arith.divf %242, %243 : vector<8x256xf32>
    %245 = vector.extract_strided_slice %244 {offsets = [0, 0], sizes = [8, 128], strides = [1, 1]} : vector<8x256xf32> to vector<8x128xf32>
    %246 = vector.extract_strided_slice %244 {offsets = [0, 128], sizes = [8, 128], strides = [1, 1]} : vector<8x256xf32> to vector<8x128xf32>
    %247 = vector.extract_strided_slice %234 {offsets = [0, 256], sizes = [8, 128], strides = [1, 1]} : vector<8x384xf32> to vector<8x128xf32>
    %248 = vector.extract_strided_slice %236 {offsets = [0, 256], sizes = [8, 128], strides = [1, 1]} : vector<8x384xf32> to vector<8x128xf32>
    %249 = arith.addf %248, %22 : vector<8x128xf32>
    %250 = arith.mulf %245, %249 : vector<8x128xf32>
    %251 = arith.addf %247, %250 : vector<8x128xf32>
    %252 = math.tanh %251 : vector<8x128xf32>
    %cst_69 = arith.constant 1.000000e+00 : f32
    %253 = vector.broadcast %cst_69 : f32 to vector<8x128xf32>
    %254 = arith.subf %253, %246 : vector<8x128xf32>
    %255 = arith.mulf %254, %252 : vector<8x128xf32>
    %256 = arith.mulf %246, %231 : vector<8x128xf32>
    %257 = arith.addf %255, %256 : vector<8x128xf32>
    %cst_70 = arith.constant 5.000000e+00 : f32
    %258 = vector.broadcast %cst_70 : f32 to vector<8x128xf32>
    %259 = arith.cmpf ogt, %7, %258 : vector<8x128xf32>
    %260 = arith.extui %259 : vector<8x128xi1> to vector<8x128xi32>
    %261 = arith.sitofp %260 : vector<8x128xi32> to vector<8x128xf32>
    %cst_71 = arith.constant 2.000000e+00 : f32
    %262 = vector.broadcast %cst_71 : f32 to vector<8x128xf32>
    %263 = arith.cmpf ogt, %7, %262 : vector<8x128xf32>
    %264 = arith.extui %263 : vector<8x128xi1> to vector<8x128xi32>
    %265 = arith.sitofp %264 : vector<8x128xi32> to vector<8x128xf32>
    %cst_72 = arith.constant 0.000000e+00 : f32
    %266 = vector.broadcast %cst_72 : f32 to vector<8x128xf32>
    %267 = arith.select %15, %265, %266 : vector<8x128xi1>, vector<8x128xf32>
    %268 = arith.select %10, %261, %267 : vector<8x128xi1>, vector<8x128xf32>
    %269 = arith.mulf %268, %257 : vector<8x128xf32>
    %cst_73 = arith.constant 1.000000e+00 : f32
    %270 = vector.broadcast %cst_73 : f32 to vector<8x128xf32>
    %271 = arith.subf %270, %268 : vector<8x128xf32>
    %272 = arith.mulf %271, %231 : vector<8x128xf32>
    %273 = arith.addf %269, %272 : vector<8x128xf32>
    %274 = arith.mulf %269, %17 : vector<8x128xf32>
    %275 = arith.mulf %273, %19 : vector<8x128xf32>
    %c48 = arith.constant 48 : index
    %c0_74 = arith.constant 0 : index
    %276 = vector.load %arg10[%c48, %c0_74] : memref<64x384xf32, #tpu.memory_space<vmem>>, vector<8x384xf32>
    %c0_75 = arith.constant 0 : index
    %c0_76 = arith.constant 0 : index
    %277 = vector.load %arg4[%c0_75, %c0_76] : memref<128x384xf32, #tpu.memory_space<vmem>>, vector<128x384xf32>
    %cst_77 = arith.constant dense<0.000000e+00> : vector<8x384xf32>
    %278 = tpu.matmul %273, %277, %cst_77 {dimension_numbers = #tpu.dot_dimension_numbers<[1], [0], [0], [1], [0, 0, 1, 1], [], []>} : vector<8x128xf32>, vector<128x384xf32>, vector<8x384xf32> -> vector<8x384xf32>
    %279 = vector.extract_strided_slice %276 {offsets = [0, 0], sizes = [8, 256], strides = [1, 1]} : vector<8x384xf32> to vector<8x256xf32>
    %280 = vector.extract_strided_slice %278 {offsets = [0, 0], sizes = [8, 256], strides = [1, 1]} : vector<8x384xf32> to vector<8x256xf32>
    %281 = arith.addf %279, %280 : vector<8x256xf32>
    %282 = arith.negf %281 : vector<8x256xf32>
    %283 = math.exp %282 : vector<8x256xf32>
    %cst_78 = arith.constant 1.000000e+00 : f32
    %284 = vector.broadcast %cst_78 : f32 to vector<8x256xf32>
    %285 = arith.addf %284, %283 : vector<8x256xf32>
    %286 = arith.divf %284, %285 : vector<8x256xf32>
    %287 = vector.extract_strided_slice %286 {offsets = [0, 0], sizes = [8, 128], strides = [1, 1]} : vector<8x256xf32> to vector<8x128xf32>
    %288 = vector.extract_strided_slice %286 {offsets = [0, 128], sizes = [8, 128], strides = [1, 1]} : vector<8x256xf32> to vector<8x128xf32>
    %289 = vector.extract_strided_slice %276 {offsets = [0, 256], sizes = [8, 128], strides = [1, 1]} : vector<8x384xf32> to vector<8x128xf32>
    %290 = vector.extract_strided_slice %278 {offsets = [0, 256], sizes = [8, 128], strides = [1, 1]} : vector<8x384xf32> to vector<8x128xf32>
    %291 = arith.addf %290, %22 : vector<8x128xf32>
    %292 = arith.mulf %287, %291 : vector<8x128xf32>
    %293 = arith.addf %289, %292 : vector<8x128xf32>
    %294 = math.tanh %293 : vector<8x128xf32>
    %cst_79 = arith.constant 1.000000e+00 : f32
    %295 = vector.broadcast %cst_79 : f32 to vector<8x128xf32>
    %296 = arith.subf %295, %288 : vector<8x128xf32>
    %297 = arith.mulf %296, %294 : vector<8x128xf32>
    %298 = arith.mulf %288, %273 : vector<8x128xf32>
    %299 = arith.addf %297, %298 : vector<8x128xf32>
    %cst_80 = arith.constant 6.000000e+00 : f32
    %300 = vector.broadcast %cst_80 : f32 to vector<8x128xf32>
    %301 = arith.cmpf ogt, %7, %300 : vector<8x128xf32>
    %302 = arith.extui %301 : vector<8x128xi1> to vector<8x128xi32>
    %303 = arith.sitofp %302 : vector<8x128xi32> to vector<8x128xf32>
    %cst_81 = arith.constant 1.000000e+00 : f32
    %304 = vector.broadcast %cst_81 : f32 to vector<8x128xf32>
    %305 = arith.cmpf ogt, %7, %304 : vector<8x128xf32>
    %306 = arith.extui %305 : vector<8x128xi1> to vector<8x128xi32>
    %307 = arith.sitofp %306 : vector<8x128xi32> to vector<8x128xf32>
    %cst_82 = arith.constant 0.000000e+00 : f32
    %308 = vector.broadcast %cst_82 : f32 to vector<8x128xf32>
    %309 = arith.select %15, %307, %308 : vector<8x128xi1>, vector<8x128xf32>
    %310 = arith.select %10, %303, %309 : vector<8x128xi1>, vector<8x128xf32>
    %311 = arith.mulf %310, %299 : vector<8x128xf32>
    %cst_83 = arith.constant 1.000000e+00 : f32
    %312 = vector.broadcast %cst_83 : f32 to vector<8x128xf32>
    %313 = arith.subf %312, %310 : vector<8x128xf32>
    %314 = arith.mulf %313, %273 : vector<8x128xf32>
    %315 = arith.addf %311, %314 : vector<8x128xf32>
    %316 = arith.mulf %311, %17 : vector<8x128xf32>
    %317 = arith.mulf %315, %19 : vector<8x128xf32>
    %c56 = arith.constant 56 : index
    %c0_84 = arith.constant 0 : index
    %318 = vector.load %arg10[%c56, %c0_84] : memref<64x384xf32, #tpu.memory_space<vmem>>, vector<8x384xf32>
    %c0_85 = arith.constant 0 : index
    %c0_86 = arith.constant 0 : index
    %319 = vector.load %arg4[%c0_85, %c0_86] : memref<128x384xf32, #tpu.memory_space<vmem>>, vector<128x384xf32>
    %cst_87 = arith.constant dense<0.000000e+00> : vector<8x384xf32>
    %320 = tpu.matmul %315, %319, %cst_87 {dimension_numbers = #tpu.dot_dimension_numbers<[1], [0], [0], [1], [0, 0, 1, 1], [], []>} : vector<8x128xf32>, vector<128x384xf32>, vector<8x384xf32> -> vector<8x384xf32>
    %321 = vector.extract_strided_slice %318 {offsets = [0, 0], sizes = [8, 256], strides = [1, 1]} : vector<8x384xf32> to vector<8x256xf32>
    %322 = vector.extract_strided_slice %320 {offsets = [0, 0], sizes = [8, 256], strides = [1, 1]} : vector<8x384xf32> to vector<8x256xf32>
    %323 = arith.addf %321, %322 : vector<8x256xf32>
    %324 = arith.negf %323 : vector<8x256xf32>
    %325 = math.exp %324 : vector<8x256xf32>
    %cst_88 = arith.constant 1.000000e+00 : f32
    %326 = vector.broadcast %cst_88 : f32 to vector<8x256xf32>
    %327 = arith.addf %326, %325 : vector<8x256xf32>
    %328 = arith.divf %326, %327 : vector<8x256xf32>
    %329 = vector.extract_strided_slice %328 {offsets = [0, 0], sizes = [8, 128], strides = [1, 1]} : vector<8x256xf32> to vector<8x128xf32>
    %330 = vector.extract_strided_slice %328 {offsets = [0, 128], sizes = [8, 128], strides = [1, 1]} : vector<8x256xf32> to vector<8x128xf32>
    %331 = vector.extract_strided_slice %318 {offsets = [0, 256], sizes = [8, 128], strides = [1, 1]} : vector<8x384xf32> to vector<8x128xf32>
    %332 = vector.extract_strided_slice %320 {offsets = [0, 256], sizes = [8, 128], strides = [1, 1]} : vector<8x384xf32> to vector<8x128xf32>
    %333 = arith.addf %332, %22 : vector<8x128xf32>
    %334 = arith.mulf %329, %333 : vector<8x128xf32>
    %335 = arith.addf %331, %334 : vector<8x128xf32>
    %336 = math.tanh %335 : vector<8x128xf32>
    %cst_89 = arith.constant 1.000000e+00 : f32
    %337 = vector.broadcast %cst_89 : f32 to vector<8x128xf32>
    %338 = arith.subf %337, %330 : vector<8x128xf32>
    %339 = arith.mulf %338, %336 : vector<8x128xf32>
    %340 = arith.mulf %330, %315 : vector<8x128xf32>
    %341 = arith.addf %339, %340 : vector<8x128xf32>
    %cst_90 = arith.constant 7.000000e+00 : f32
    %342 = vector.broadcast %cst_90 : f32 to vector<8x128xf32>
    %343 = arith.cmpf ogt, %7, %342 : vector<8x128xf32>
    %344 = arith.extui %343 : vector<8x128xi1> to vector<8x128xi32>
    %345 = arith.sitofp %344 : vector<8x128xi32> to vector<8x128xf32>
    %cst_91 = arith.constant 0.000000e+00 : f32
    %346 = vector.broadcast %cst_91 : f32 to vector<8x128xf32>
    %347 = arith.cmpf ogt, %7, %346 : vector<8x128xf32>
    %348 = arith.extui %347 : vector<8x128xi1> to vector<8x128xi32>
    %349 = arith.sitofp %348 : vector<8x128xi32> to vector<8x128xf32>
    %cst_92 = arith.constant 0.000000e+00 : f32
    %350 = vector.broadcast %cst_92 : f32 to vector<8x128xf32>
    %351 = arith.select %15, %349, %350 : vector<8x128xi1>, vector<8x128xf32>
    %352 = arith.select %10, %345, %351 : vector<8x128xi1>, vector<8x128xf32>
    %353 = arith.mulf %352, %341 : vector<8x128xf32>
    %cst_93 = arith.constant 1.000000e+00 : f32
    %354 = vector.broadcast %cst_93 : f32 to vector<8x128xf32>
    %355 = arith.subf %354, %352 : vector<8x128xf32>
    %356 = arith.mulf %355, %315 : vector<8x128xf32>
    %357 = arith.addf %353, %356 : vector<8x128xf32>
    %358 = arith.mulf %353, %17 : vector<8x128xf32>
    %359 = arith.mulf %357, %19 : vector<8x128xf32>
    %360 = arith.addf %64, %359 : vector<8x128xf32>
    %c0_94 = arith.constant 0 : index
    %c0_95 = arith.constant 0 : index
    %c0_96 = arith.constant 0 : index
    %361 = vector.load %arg8[%c0_94, %c0_95, %c0_96] : memref<8x8x128xf32, #tpu.memory_space<vmem>>, vector<1x8x128xf32>
    %362 = vector.shape_cast %361 : vector<1x8x128xf32> to vector<8x128xf32>
    %363 = vector.shape_cast %360 : vector<8x128xf32> to vector<1x8x128xf32>
    tpu.vector_store %arg8[%c0_94, %c0_95, %c0_96], %363 {strides = array<i32>} : memref<8x8x128xf32, #tpu.memory_space<vmem>>, vector<1x8x128xf32>,
    %364 = arith.addf %106, %317 : vector<8x128xf32>
    %c1 = arith.constant 1 : index
    %c0_97 = arith.constant 0 : index
    %c0_98 = arith.constant 0 : index
    %365 = vector.load %arg8[%c1, %c0_97, %c0_98] : memref<8x8x128xf32, #tpu.memory_space<vmem>>, vector<1x8x128xf32>
    %366 = vector.shape_cast %365 : vector<1x8x128xf32> to vector<8x128xf32>
    %367 = vector.shape_cast %364 : vector<8x128xf32> to vector<1x8x128xf32>
    tpu.vector_store %arg8[%c1, %c0_97, %c0_98], %367 {strides = array<i32>} : memref<8x8x128xf32, #tpu.memory_space<vmem>>, vector<1x8x128xf32>,
    %368 = arith.addf %148, %275 : vector<8x128xf32>
    %c2 = arith.constant 2 : index
    %c0_99 = arith.constant 0 : index
    %c0_100 = arith.constant 0 : index
    %369 = vector.load %arg8[%c2, %c0_99, %c0_100] : memref<8x8x128xf32, #tpu.memory_space<vmem>>, vector<1x8x128xf32>
    %370 = vector.shape_cast %369 : vector<1x8x128xf32> to vector<8x128xf32>
    %371 = vector.shape_cast %368 : vector<8x128xf32> to vector<1x8x128xf32>
    tpu.vector_store %arg8[%c2, %c0_99, %c0_100], %371 {strides = array<i32>} : memref<8x8x128xf32, #tpu.memory_space<vmem>>, vector<1x8x128xf32>,
    %372 = arith.addf %190, %233 : vector<8x128xf32>
    %c3 = arith.constant 3 : index
    %c0_101 = arith.constant 0 : index
    %c0_102 = arith.constant 0 : index
    %373 = vector.load %arg8[%c3, %c0_101, %c0_102] : memref<8x8x128xf32, #tpu.memory_space<vmem>>, vector<1x8x128xf32>
    %374 = vector.shape_cast %373 : vector<1x8x128xf32> to vector<8x128xf32>
    %375 = vector.shape_cast %372 : vector<8x128xf32> to vector<1x8x128xf32>
    tpu.vector_store %arg8[%c3, %c0_101, %c0_102], %375 {strides = array<i32>} : memref<8x8x128xf32, #tpu.memory_space<vmem>>, vector<1x8x128xf32>,
    %376 = arith.addf %232, %191 : vector<8x128xf32>
    %c4 = arith.constant 4 : index
    %c0_103 = arith.constant 0 : index
    %c0_104 = arith.constant 0 : index
    %377 = vector.load %arg8[%c4, %c0_103, %c0_104] : memref<8x8x128xf32, #tpu.memory_space<vmem>>, vector<1x8x128xf32>
    %378 = vector.shape_cast %377 : vector<1x8x128xf32> to vector<8x128xf32>
    %379 = vector.shape_cast %376 : vector<8x128xf32> to vector<1x8x128xf32>
    tpu.vector_store %arg8[%c4, %c0_103, %c0_104], %379 {strides = array<i32>} : memref<8x8x128xf32, #tpu.memory_space<vmem>>, vector<1x8x128xf32>,
    %380 = arith.addf %274, %149 : vector<8x128xf32>
    %c5 = arith.constant 5 : index
    %c0_105 = arith.constant 0 : index
    %c0_106 = arith.constant 0 : index
    %381 = vector.load %arg8[%c5, %c0_105, %c0_106] : memref<8x8x128xf32, #tpu.memory_space<vmem>>, vector<1x8x128xf32>
    %382 = vector.shape_cast %381 : vector<1x8x128xf32> to vector<8x128xf32>
    %383 = vector.shape_cast %380 : vector<8x128xf32> to vector<1x8x128xf32>
    tpu.vector_store %arg8[%c5, %c0_105, %c0_106], %383 {strides = array<i32>} : memref<8x8x128xf32, #tpu.memory_space<vmem>>, vector<1x8x128xf32>,
    %384 = arith.addf %316, %107 : vector<8x128xf32>
    %c6 = arith.constant 6 : index
    %c0_107 = arith.constant 0 : index
    %c0_108 = arith.constant 0 : index
    %385 = vector.load %arg8[%c6, %c0_107, %c0_108] : memref<8x8x128xf32, #tpu.memory_space<vmem>>, vector<1x8x128xf32>
    %386 = vector.shape_cast %385 : vector<1x8x128xf32> to vector<8x128xf32>
    %387 = vector.shape_cast %384 : vector<8x128xf32> to vector<1x8x128xf32>
    tpu.vector_store %arg8[%c6, %c0_107, %c0_108], %387 {strides = array<i32>} : memref<8x8x128xf32, #tpu.memory_space<vmem>>, vector<1x8x128xf32>,
    %388 = arith.addf %358, %65 : vector<8x128xf32>
    %c7 = arith.constant 7 : index
    %c0_109 = arith.constant 0 : index
    %c0_110 = arith.constant 0 : index
    %389 = vector.load %arg8[%c7, %c0_109, %c0_110] : memref<8x8x128xf32, #tpu.memory_space<vmem>>, vector<1x8x128xf32>
    %390 = vector.shape_cast %389 : vector<1x8x128xf32> to vector<8x128xf32>
    %391 = vector.shape_cast %388 : vector<8x128xf32> to vector<1x8x128xf32>
    tpu.vector_store %arg8[%c7, %c0_109, %c0_110], %391 {strides = array<i32>} : memref<8x8x128xf32, #tpu.memory_space<vmem>>, vector<1x8x128xf32>,
    %c0_111 = arith.constant 0 : index
    %c0_112 = arith.constant 0 : index
    %392 = vector.load %arg6[%c0_111, %c0_112] : memref<128x128xf32, #tpu.memory_space<vmem>>, vector<128x128xf32>
    %cst_113 = arith.constant dense<0.000000e+00> : vector<8x128xf32>
    %393 = tpu.matmul %357, %392, %cst_113 {dimension_numbers = #tpu.dot_dimension_numbers<[1], [0], [0], [1], [0, 0, 1, 1], [], []>} : vector<8x128xf32>, vector<128x128xf32>, vector<8x128xf32> -> vector<8x128xf32>
    %c0_114 = arith.constant 0 : index
    %c0_115 = arith.constant 0 : index
    %394 = vector.load %arg7[%c0_114, %c0_115] : memref<1x128xf32, #tpu.memory_space<vmem>>, vector<1x128xf32>
    %395 = vector.broadcast %394 : vector<1x128xf32> to vector<8x128xf32>
    %396 = arith.addf %393, %395 : vector<8x128xf32>
    %397 = math.tanh %396 : vector<8x128xf32>
    %c0_116 = arith.constant 0 : index
    %c0_117 = arith.constant 0 : index
    %398 = vector.load %arg9[%c0_116, %c0_117] : memref<8x128xf32, #tpu.memory_space<vmem>>, vector<8x128xf32>
    tpu.vector_store %arg9[%c0_116, %c0_117], %397 {strides = array<i32>} : memref<8x128xf32, #tpu.memory_space<vmem>>, vector<8x128xf32>,
    return
  }
}

</mosaic_0001>

<bundles_post_ra>
// kernel: tpu_custom_call.1
= control target key start
LH: loop header
LB: loop body
LE: loop exit
PB: predicated region body
PF: predicated region fallthrough
CT: control target
= control target key end

     0   :  { %15 = vsyncpa [#allocation4], 0  ;;  %s4054_s0 = inlined_call_operand.hbm [shape: f32[64,64], index: 0, kind: input, shape index: {}]   ;;  %s4055_s1 = inlined_call_operand.hbm [shape: f32[8,128], index: 1, kind: input, shape index: {}]   ;;  %s4056_s2 = inlined_call_operand.hbm [shape: f32[64,384], index: 2, kind: input, shape index: {}]   ;;  %s4057_s3 = inlined_call_operand.vmem [shape: f32[1,384], index: 3, kind: input, shape index: {}]   ;;  %s4058_s4 = inlined_call_operand.hbm [shape: f32[128,384], index: 4, kind: input, shape index: {}]   ;;  %s4059_s5 = inlined_call_operand.vmem [shape: f32[1,128], index: 5, kind: input, shape index: {}]   ;;  %s4060_s6 = inlined_call_operand.hbm [shape: f32[128,128], index: 6, kind: input, shape index: {}]   ;;  %s4061_s7 = inlined_call_operand.vmem [shape: f32[1,128], index: 7, kind: input, shape index: {}]   ;;  %s4062_s8 = inlined_call_operand.hbm [shape: f32[8,8,128], index: 8, kind: output, shape index: {0}]   ;;  %s4063_s9 = inlined_call_operand.hbm [shape: f32[8,128], index: 9, kind: output, shape index: {1}]  }
   0x1   :  { %16 = vsyncpa [#allocation7], 0 }
   0x2   :  { %17 = vsyncpa [#allocation10], 0 }
   0x3   :  { %18 = vsyncpa [#allocation5], 0 }
   0x4   :  { %19 = vsyncpa [#allocation14], 0  ;;  %s2898_s30 = smov [#allocation6]  }
   0x5   :  { %s38_s10 = sshll.u32 %s2898_s30, 4  ;;  %s39_s10 = int_to_ptr.vmem [resolvable:$true] %s38_s10 }
   0x6   :  { %s2756_s11 = scalar_lea.vmem %s39_s10, 128  ;;  %p2761_p1 = scmp.lt.s32.totalorder %s39_s10, %s39_s10 }
   0x7   :  { %p2757_p0 = scmp.ne.s32.totalorder %s39_s10, %s2756_s11  ;;  %p2762_p2 = scmp.lt.s32.totalorder %s2756_s11, %s2756_s11 }
   0x9   :  { %p2763_p3 = por %p2762_p2, %p2761_p1 }
   0xb   :  { %p2764_p4 = pnand %p2763_p3, %p2757_p0 }
   0xd   :  { %2767 = shalt.err (!%p2764_p4)
}
   0xe   :  { %41 = dma.hbm_to_vmem [thread:$0]  %s4055_s1, 128, %s39_s10, [#allocation7]  }
   0xf   :  { %s2899_s14 = smov [#allocation9]   ;;  %s2900_s16 = smov [#allocation3]  }
  0x10   :  { %s61_s15 = sshll.u32 %s2899_s14, 4  ;;  %s25_s17 = sshll.u32 %s2900_s16, 4  ;;  %s62_s15 = int_to_ptr.vmem [resolvable:$true] %s61_s15  ;;  %s26_s17 = int_to_ptr.vmem [resolvable:$true] %s25_s17 }
  0x11   :  { %s2776_s18 = scalar_lea.vmem %s62_s15, 6144  ;;  %p2781_p6 = scmp.lt.s32.totalorder %s62_s15, %s62_s15 }
  0x12   :  { %p2777_p5 = scmp.ne.s32.totalorder %s62_s15, %s2776_s18  ;;  %p2782_p7 = scmp.lt.s32.totalorder %s2776_s18, %s2776_s18 }
  0x14   :  { %p2783_p8 = por %p2782_p7, %p2781_p6 }
  0x16   :  { %p2784_p9 = pnand %p2783_p8, %p2777_p5 }
  0x18   :  { %2787 = shalt.err (!%p2784_p9)
}
  0x19   :  { %s2901_s19 = smov 384   ;;  %s2902_s20 = smov 24  }
  0x1a   :  { %67 = dma.hbm_to_vmem [thread:$0]  %s4058_s4, 6144, %s62_s15, [#allocation10], %s2901_s19, %s2901_s19, %s2902_s20  }
  0x1b   :  { %s2796_s1 = scalar_lea.vmem %s26_s17, 1024  ;;  %p2801_p11 = scmp.lt.s32.totalorder %s26_s17, %s26_s17 }
  0x1c   :  { %p2797_p10 = scmp.ne.s32.totalorder %s26_s17, %s2796_s1  ;;  %p2802_p12 = scmp.lt.s32.totalorder %s2796_s1, %s2796_s1 }
  0x1e   :  { %p2803_p13 = por %p2802_p12, %p2801_p11 }
  0x20   :  { %p2804_p0 = pnand %p2803_p13, %p2797_p10 }
  0x22   :  { %2807 = shalt.err (!%p2804_p0)
}
  0x23   :  { %s2903_s23 = smov 128   ;;  %s2904_s24 = smov 8  }
  0x24   :  { %31 = dma.hbm_to_vmem [thread:$0]  %s4054_s0, 1024, %s26_s17, [#allocation4], %s2903_s23, %s2903_s23, %s2904_s24  }
  0x25   :  { %s2905_s27 = smov [#allocation8]   ;;  %s2906_s4 = smov [#allocation11]  }
  0x26   :  { %s47_s28 = sshll.u32 %s2905_s27, 4  ;;  %s75_s29 = sshll.u32 %s2906_s4, 4  ;;  %s48_s28 = int_to_ptr.vmem [resolvable:$true] %s47_s28  ;;  %s76_s29 = int_to_ptr.vmem [resolvable:$true] %s75_s29 }
  0x27   :  { %s2816_s30 = scalar_lea.vmem %s48_s28, 3072  ;;  %p2821_p2 = scmp.lt.s32.totalorder %s48_s28, %s48_s28 }
  0x28   :  { %p2817_p1 = scmp.ne.s32.totalorder %s48_s28, %s2816_s30  ;;  %p2822_p3 = scmp.lt.s32.totalorder %s2816_s30, %s2816_s30 }
  0x2a   :  { %p2823_p4 = por %p2822_p3, %p2821_p2 }
  0x2c   :  { %p2824_p5 = pnand %p2823_p4, %p2817_p1 }
  0x2e   :  { %2827 = shalt.err (!%p2824_p5)
}
  0x2f   :  { %53 = dma.hbm_to_vmem [thread:$0]  %s4056_s2, 3072, %s48_s28, [#allocation7], %s2901_s19, %s2901_s19, %s2902_s20  }
  0x30   :  { %s2836_s12 = scalar_lea.vmem %s76_s29, 2048  ;;  %p2841_p7 = scmp.lt.s32.totalorder %s76_s29, %s76_s29 }
  0x31   :  { %p2837_p6 = scmp.ne.s32.totalorder %s76_s29, %s2836_s12  ;;  %p2842_p8 = scmp.lt.s32.totalorder %s2836_s12, %s2836_s12 }
  0x33   :  { %p2843_p9 = por %p2842_p8, %p2841_p7 }
  0x35   :  { %p2844_p10 = pnand %p2843_p9, %p2837_p6 }
  0x37   :  { %2847 = shalt.err (!%p2844_p10)
}
  0x38   :  { %81 = dma.hbm_to_vmem [thread:$0]  %s4060_s6, 2048, %s76_s29, [#allocation10], %s2903_s23, %s2903_s23, %s2904_s24  }
  0x39   :  { %2888 = dma.done.wait [#allocation4], 1024  }
  0x3a   :  { %2889 = vsyncadd [#allocation4], 4294966272 }
  0x3b   :  { %2890 = dma.done.wait [#allocation7], 3200  }
  0x3c   :  { %2891 = vsyncadd [#allocation7], 4294964096 }
  0x3d   :  { %2892 = dma.done.wait [#allocation10], 8192  }
  0x3e   :  { %2893 = vsyncadd [#allocation10], 4294959104  ;;  %v4064_v0 = vmov 0.0   ;;  %v129_v1 = vld [vmem:[#allocation8 + $0xb0] sm:$0xff]  ;;  %v128_v2 = vld [vmem:[#allocation8 + $0xa8] sm:$0xff]  ;;  %vm148_vm0 = vcmask 523264  }
  0x3f   :  { %237 = vmatprep.mubr.f32.mxu0 %v4064_v0  ;;  %v126_v3 = vld [vmem:[#allocation8 + $0x98] sm:$0xff]  ;;  %189 = vmatprep.subr.mxu0 %v129_v1  ;;  %v125_v4 = vld [vmem:[#allocation8 + $0x90] sm:$0xff]  ;;  %v123_v5 = vld [vmem:[#allocation8 + $0x80] sm:$0xff]  ;;  %vm2908_vm1 = vmmov 0  }
  0x40   :  { %190 = vmatpush1.msra.mxu0 %v128_v2  ;;  %v122_v6 = vld [vmem:[#allocation8 + $0x78] sm:$0xff]  ;;  %v120_v7 = vld [vmem:[#allocation8 + $0x68] sm:$0xff]  ;;  %v119_v8 = vld [vmem:[#allocation8 + $0x60] sm:$0xff] }
  0x41   :  { %191 = vmatprep.subr.mxu0 %v126_v3  ;;  %v99_v9 = vld [vmem:[#allocation3] sm:$0xff]  ;;  %v117_v10 = vld [vmem:[#allocation8 + $0x50] sm:$0xff]  ;;  %v116_v11 = vld [vmem:[#allocation8 + $0x48] sm:$0xff] }
  0x42   :  { %192 = vmatpush1.msra.mxu0 %v125_v4  ;;  %2277 = vmatprep.mubr.msk.f32.mxu1 %vm148_vm0, %v99_v9  ;;  %v114_v12 = vld [vmem:[#allocation8 + $0x38] sm:$0xff]  ;;  %v113_v13 = vld [vmem:[#allocation8 + $0x30] sm:$0xff]  ;;  %v111_v14 = vld [vmem:[#allocation8 + $0x20] sm:$0xff] }
  0x43   :  { %193 = vmatprep.subr.mxu0 %v123_v5  ;;  %v110_v15 = vld [vmem:[#allocation8 + $0x18] sm:$0xff]  ;;  %v108_v17 = vld [vmem:[#allocation8 + $0x8] sm:$0xff]  ;;  %v107_v18 = vld [vmem:[#allocation8] sm:$0xff] }
  0x44   :  { %194 = vmatpush1.msra.mxu0 %v122_v6  ;;  %v130_v16 = vld [vmem:[#allocation8 + $0xb8] sm:$0xff]  ;;  %v127_v19 = vld [vmem:[#allocation8 + $0xa0] sm:$0xff]  ;;  %v2984_v20 = vld [vmem:[#allocation9 + $0x170] sm:$0xff] }
  0x45   :  { %195 = vmatprep.subr.mxu0 %v120_v7  ;;  %2261 = vmatprep.subr.mxu1 %v130_v16  ;;  %4118 = vst [vmem:[#allocation20_spill] sm:$0xff] %v2984_v20  ;;  %v124_v21 = vld [vmem:[#allocation8 + $0x88] sm:$0xff]  ;;  %v2988_v23 = vld [vmem:[#allocation9 + $0x158] sm:$0xff]  ;;  %v2992_v24 = vld [vmem:[#allocation9 + $0x150] sm:$0xff] }
  0x46   :  { %196 = vmatpush1.msra.mxu0 %v119_v8  ;;  %2262 = vmatpush3.msra.mxu1 %v130_v16  ;;  %v2986_v22 = vld [vmem:[#allocation9 + $0x168] sm:$0xff]  ;;  %v121_v25 = vld [vmem:[#allocation8 + $0x70] sm:$0xff]  ;;  %v2996_v26 = vld [vmem:[#allocation3 + $0x8] sm:$0xff] }
  0x47   :  { %197 = vmatprep.subr.mxu0 %v117_v10  ;;  %2263 = vmatprep.subr.mxu1 %v127_v19  ;;  %v2998_v27 = vld [vmem:[#allocation9 + $0x140] sm:$0xff]  ;;  %v3001_v28 = vld [vmem:[#allocation9 + $0x138] sm:$0xff]  ;;  %v3004_v29 = vld [vmem:[#allocation9 + $0x128] sm:$0xff] }
  0x48   :  { %198 = vmatpush1.msra.mxu0 %v116_v11  ;;  %2264 = vmatpush3.msra.mxu1 %v127_v19  ;;  %v3009_v30 = vld [vmem:[#allocation9 + $0x120] sm:$0xff]  ;;  %v118_v31 = vld [vmem:[#allocation8 + $0x58] sm:$0xff]  ;;  %v3013_v32 = vld [vmem:[#allocation3 + $0x10] sm:$0xff] }
  0x49   :  { %199 = vmatprep.subr.mxu0 %v114_v12  ;;  %2265 = vmatprep.subr.mxu1 %v124_v21  ;;  %v3015_v33 = vld [vmem:[#allocation9 + $0x110] sm:$0xff]  ;;  %v3018_v34 = vld [vmem:[#allocation9 + $0x108] sm:$0xff]  ;;  %v3021_v35 = vld [vmem:[#allocation9 + $0xf8] sm:$0xff] }
  0x4a   :  { %200 = vmatpush1.msra.mxu0 %v113_v13  ;;  %2266 = vmatpush3.msra.mxu1 %v124_v21  ;;  %v3026_v36 = vld [vmem:[#allocation9 + $0xf0] sm:$0xff]  ;;  %v115_v37 = vld [vmem:[#allocation8 + $0x40] sm:$0xff]  ;;  %v3035_v40 = vld [vmem:[#allocation9 + $0xd8] sm:$0xff] }
  0x4b   :  { %201 = vmatprep.subr.mxu0 %v111_v14  ;;  %2267 = vmatprep.subr.mxu1 %v121_v25  ;;  %v3030_v38 = vld [vmem:[#allocation3 + $0x18] sm:$0xff]  ;;  %v3032_v39 = vld [vmem:[#allocation9 + $0xe0] sm:$0xff]  ;;  %v3038_v41 = vld [vmem:[#allocation9 + $0xc8] sm:$0xff] }
  0x4c   :  { %202 = vmatpush1.msra.mxu0 %v110_v15  ;;  %2268 = vmatpush3.msra.mxu1 %v121_v25  ;;  %v3043_v42 = vld [vmem:[#allocation9 + $0xc0] sm:$0xff]  ;;  %v112_v43 = vld [vmem:[#allocation8 + $0x28] sm:$0xff]  ;;  %v3047_v44 = vld [vmem:[#allocation3 + $0x20] sm:$0xff] }
  0x4d   :  { %203 = vmatprep.subr.mxu0 %v108_v17  ;;  %2269 = vmatprep.subr.mxu1 %v118_v31  ;;  %v3049_v45 = vld [vmem:[#allocation9 + $0xb0] sm:$0xff]  ;;  %v3052_v46 = vld [vmem:[#allocation9 + $0xa8] sm:$0xff]  ;;  %v3055_v47 = vld [vmem:[#allocation9 + $0x98] sm:$0xff] }
  0x4e   :  { %204 = vmatpush1.msra.mxu0 %v107_v18  ;;  %2270 = vmatpush3.msra.mxu1 %v118_v31  ;;  %v3060_v48 = vld [vmem:[#allocation9 + $0x90] sm:$0xff]  ;;  %v3064_v50 = vld [vmem:[#allocation3 + $0x28] sm:$0xff]  ;;  %v3069_v52 = vld [vmem:[#allocation9 + $0x78] sm:$0xff]  ;;  %v4066_v18 = vlaneseq }
  0x4f   :  { %2048 = vmatmul.mubr.msk.f32.vlgmr.msra.gmra.mxu0 %vm148_vm0, %v99_v9  ;;  %484 = vmatprep.subr.mxu0 %v2984_v20  ;;  %v109_v49 = vld [vmem:[#allocation8 + $0x10] sm:$0xff]  ;;  %v3066_v51 = vld [vmem:[#allocation9 + $0x80] sm:$0xff]  ;;  %v3072_v53 = vld [vmem:[#allocation9 + $0x68] sm:$0xff] }
  0x50   :  { %485 = vmatpush1.msra.mxu0 %v2986_v22  ;;  %243 = vmatprep.mubr.f32.mxu0 %v4064_v0  ;;  %v3077_v54 = vld [vmem:[#allocation9 + $0x60] sm:$0xff]  ;;  %v105_v55 = vld [vmem:[#allocation3 + $0x30] sm:$0xff]  ;;  %v3081_v56 = vld [vmem:[#allocation9 + $0x50] sm:$0xff]  ;;  %v134_v19 = vshrl.u32 %v4066_v18, 7 }
  0x51   :  { %486 = vmatprep.subr.mxu0 %v2988_v23  ;;  %2271 = vmatprep.subr.mxu1 %v115_v37  ;;  %v3084_v57 = vld [vmem:[#allocation9 + $0x48] sm:$0xff]  ;;  %v3087_v58 = vld [vmem:[#allocation9 + $0x38] sm:$0xff]  ;;  %v3092_v59 = vld [vmem:[#allocation9 + $0x30] sm:$0xff] }
  0x52   :  { %487 = vmatpush1.msra.mxu0 %v2992_v24  ;;  %2272 = vmatpush3.msra.mxu1 %v115_v37  ;;  %v3094_v60 = vld [vmem:[#allocation9 + $0x178] sm:$0xff]  ;;  %v106_v61 = vld [vmem:[#allocation3 + $0x38] sm:$0xff]  ;;  %v3098_v62 = vld [vmem:[#allocation9 + $0x20] sm:$0xff]  ;;  %v135_v21 = vsub.s32 0, %v134_v19  ;;  %v139_v31 = vsub.s32 1, %v134_v19 }
  0x53   :  { %2049 = vmatmul.mubr.msk.f32.gmra.mxu0 %vm148_vm0, %v2996_v26  ;;  %488 = vmatprep.subr.mxu0 %v2998_v27  ;;  %4119 = vst [vmem:[#allocation21_spill] sm:$0xff] %v3098_v62  ;;  %v3101_v63 = vld [vmem:[#allocation9 + $0x18] sm:$0xff]  ;;  %v3106_v1 = vld [vmem:[#allocation9 + $0x8] sm:$0xff]  ;;  %v3111_v2 = vld [vmem:[#allocation9] sm:$0xff] }
  0x54   :  { %489 = vmatpush1.msra.mxu0 %v3001_v28  ;;  %249 = vmatprep.mubr.f32.mxu0 %v4064_v0  ;;  %4120 = vst [vmem:[#allocation22_spill] sm:$0xff] %v3101_v63  ;;  %4121 = vst [vmem:[#allocation23_spill] sm:$0xff] %v3106_v1  ;;  %v3113_v3 = vld [vmem:[#allocation9 + $0x160] sm:$0xff]  ;;  %v3119_v4 = vld [vmem:[#allocation9 + $0x148] sm:$0xff] }
  0x55   :  { %490 = vmatprep.subr.mxu0 %v3004_v29  ;;  %2273 = vmatprep.subr.mxu1 %v112_v43  ;;  %4122 = vst [vmem:[#allocation24_spill] sm:$0xff] %v3111_v2  ;;  %v3125_v5 = vld [vmem:[#allocation9 + $0x130] sm:$0xff]  ;;  %v3131_v6 = vld [vmem:[#allocation9 + $0x118] sm:$0xff]  ;;  %v3139_v7 = vld [vmem:[#allocation9 + $0x100] sm:$0xff] }
  0x56   :  { %491 = vmatpush1.msra.mxu0 %v3009_v30  ;;  %2274 = vmatpush3.msra.mxu1 %v112_v43  ;;  %v3145_v8 = vld [vmem:[#allocation9 + $0xe8] sm:$0xff]  ;;  %v3152_v9 = vld [vmem:[#allocation9 + $0xd0] sm:$0xff]  ;;  %v3158_v10 = vld [vmem:[#allocation9 + $0xb8] sm:$0xff] }
  0x57   :  { %2050 = vmatmul.mubr.msk.f32.gmra.mxu0 %vm148_vm0, %v3013_v32  ;;  %492 = vmatprep.subr.mxu0 %v3015_v33  ;;  %v3165_v11 = vld [vmem:[#allocation9 + $0xa0] sm:$0xff]  ;;  %v3171_v12 = vld [vmem:[#allocation9 + $0x88] sm:$0xff]  ;;  %v3177_v13 = vld [vmem:[#allocation9 + $0x70] sm:$0xff] }
  0x58   :  { %493 = vmatpush1.msra.mxu0 %v3018_v34  ;;  %255 = vmatprep.mubr.f32.mxu0 %v4064_v0  ;;  %v3183_v14 = vld [vmem:[#allocation9 + $0x58] sm:$0xff]  ;;  %v3189_v15 = vld [vmem:[#allocation9 + $0x40] sm:$0xff]  ;;  %v3195_v16 = vld [vmem:[#allocation9 + $0x28] sm:$0xff] }
  0x59   :  { %494 = vmatprep.subr.mxu0 %v3021_v35  ;;  %2275 = vmatprep.subr.mxu1 %v109_v49  ;;  %4123 = vst [vmem:[#allocation25_spill] sm:$0xff] %v3189_v15  ;;  %4124 = vst [vmem:[#allocation26_spill] sm:$0xff] %v3195_v16  ;;  %v3201_v17 = vld [vmem:[#allocation9 + $0x10] sm:$0xff]  ;;  %v131_v25 = vld [vmem:[%s4057_s3] sm:$0x7] }
  0x5a   :  { %495 = vmatpush1.msra.mxu0 %v3026_v36  ;;  %2276 = vmatpush3.msra.mxu1 %v109_v49  ;;  %4125 = vst [vmem:[#allocation27_spill] sm:$0xff] %v3201_v17  ;;  %v136_v37 = vrot.slane %v131_v25, %v135_v21  ;;  %v140_v43 = vrot.slane %v131_v25, %v139_v31 }
  0x5b   :  { %2051 = vmatmul.mubr.msk.f32.gmra.mxu0 %vm148_vm0, %v3030_v38  ;;  %496 = vmatprep.subr.mxu0 %v3032_v39 }
  0x5c   :  { %497 = vmatpush1.msra.mxu0 %v3035_v40  ;;  %261 = vmatprep.mubr.f32.mxu0 %v4064_v0 }
  0x5d   :  { %498 = vmatprep.subr.mxu0 %v3038_v41  ;;  %2289 = vmatprep.subr.mxu1 %v4064_v0 }
  0x5e   :  { %499 = vmatpush1.msra.mxu0 %v3043_v42  ;;  %2278 = vmatmul.mubr.msk.f32.vlgmr.msra.gmra.mxu1 %vm148_vm0, %v2996_v26 }
  0x5f   :  { %2052 = vmatmul.mubr.msk.f32.gmra.mxu0 %vm148_vm0, %v3047_v44  ;;  %500 = vmatprep.subr.mxu0 %v3049_v45 }
  0x60   :  { %501 = vmatpush1.msra.mxu0 %v3052_v46  ;;  %267 = vmatprep.mubr.f32.mxu0 %v4064_v0 }
  0x61   :  { %502 = vmatprep.subr.mxu0 %v3055_v47  ;;  %2290 = vmatpush3.msra.mxu1 %v3094_v60 }
  0x62   :  { %503 = vmatpush1.msra.mxu0 %v3060_v48  ;;  %2291 = vmatprep.subr.mxu1 %v4064_v0 }
  0x63   :  { %2053 = vmatmul.mubr.msk.f32.gmra.mxu0 %vm148_vm0, %v3064_v50  ;;  %504 = vmatprep.subr.mxu0 %v3066_v51 }
  0x64   :  { %505 = vmatpush1.msra.mxu0 %v3069_v52  ;;  %273 = vmatprep.mubr.f32.mxu0 %v4064_v0 }
  0x65   :  { %506 = vmatprep.subr.mxu0 %v3072_v53  ;;  %2292 = vmatpush3.msra.mxu1 %v3113_v3 }
  0x66   :  { %507 = vmatpush1.msra.mxu0 %v3077_v54  ;;  %2293 = vmatprep.subr.mxu1 %v4064_v0 }
  0x67   :  { %2054 = vmatmul.mubr.msk.f32.gmra.mxu0 %vm148_vm0, %v105_v55  ;;  %508 = vmatprep.subr.mxu0 %v3081_v56 }
  0x68   :  { %509 = vmatpush1.msra.mxu0 %v3084_v57  ;;  %279 = vmatprep.mubr.f32.mxu0 %v4064_v0 }
  0x69   :  { %510 = vmatprep.subr.mxu0 %v3087_v58  ;;  %2294 = vmatpush3.msra.mxu1 %v3119_v4 }
  0x6a   :  { %511 = vmatpush1.msra.mxu0 %v3092_v59  ;;  %2280 = vmatprep.mubr.msk.f32.mxu1 %vm148_vm0, %v3013_v32 }
  0x6b   :  { %2055 = vmatmul.mubr.msk.f32.gmra.mxu0 %vm148_vm0, %v106_v61  ;;  %512 = vmatprep.subr.mxu0 %v3098_v62 }
  0x6c   :  { %513 = vmatpush1.msra.mxu0 %v3101_v63  ;;  %548 = vmatprep.mubr.f32.mxu0 %v4064_v0 }
  0x6d   :  { %514 = vmatprep.subr.mxu0 %v3106_v1  ;;  %2295 = vmatprep.subr.mxu1 %v4064_v0 }
  0x6e   :  { %515 = vmatpush1.msra.mxu0 %v3111_v2  ;;  %2281 = vmatmul.mubr.msk.f32.gmra.mxu1 %vm148_vm0, %v3030_v38 }
  0x6f   :  { %549 = vmatmul.mubr.f32.vlgmr.msra.gmra.mxu0 %v4064_v0  ;;  %2296 = vmatpush3.msra.mxu1 %v3125_v5 }
  0x70   :  { %2283 = vmatprep.mubr.msk.f32.mxu1 %vm148_vm0, %v3047_v44  ;;  %2297 = vmatprep.subr.mxu1 %v4064_v0 }
  0x71   :  { %664 = vmatprep.subr.mxu0 %v2984_v20  ;;  %2298 = vmatpush3.msra.mxu1 %v3131_v6 }
  0x72   :  { %665 = vmatpush1.msra.mxu0 %v2986_v22  ;;  %2299 = vmatprep.subr.mxu1 %v4064_v0 }
  0x73   :  { %2284 = vmatmul.mubr.msk.f32.gmra.mxu1 %vm148_vm0, %v3064_v50  ;;  %666 = vmatprep.subr.mxu0 %v2988_v23 }
  0x74   :  { %2300 = vmatpush3.msra.mxu1 %v3139_v7  ;;  %2286 = vmatprep.mubr.msk.f32.mxu1 %vm148_vm0, %v105_v55 }
  0x75   :  { %2301 = vmatprep.subr.mxu1 %v4064_v0  ;;  %667 = vmatpush1.msra.mxu0 %v2992_v24 }
  0x76   :  { %2302 = vmatpush3.msra.mxu1 %v3145_v8  ;;  %668 = vmatprep.subr.mxu0 %v2998_v27 }
  0x77   :  { %2303 = vmatprep.subr.mxu1 %v4064_v0  ;;  %2287 = vmatmul.mubr.msk.f32.gmra.mxu1 %vm148_vm0, %v106_v61 }
  0x78   :  { %2304 = vmatpush3.msra.mxu1 %v3152_v9  ;;  %2321 = vmatprep.mubr.msk.f32.mxu1 %vm2908_vm1, %v4064_v0 }
  0x79   :  { %2305 = vmatprep.subr.mxu1 %v4064_v0  ;;  %669 = vmatpush1.msra.mxu0 %v3001_v28 }
  0x7a   :  { %2306 = vmatpush3.msra.mxu1 %v3158_v10  ;;  %670 = vmatprep.subr.mxu0 %v3004_v29 }
  0x7b   :  { %2307 = vmatprep.subr.mxu1 %v4064_v0  ;;  %671 = vmatpush1.msra.mxu0 %v3009_v30 }
  0x7c   :  { %2308 = vmatpush3.msra.mxu1 %v3165_v11  ;;  %672 = vmatprep.subr.mxu0 %v3015_v33 }
  0x7d   :  { %2309 = vmatprep.subr.mxu1 %v4064_v0  ;;  %673 = vmatpush1.msra.mxu0 %v3018_v34 }
  0x7e   :  { %2310 = vmatpush3.msra.mxu1 %v3171_v12  ;;  %674 = vmatprep.subr.mxu0 %v3021_v35 }
  0x7f   :  { %2311 = vmatprep.subr.mxu1 %v4064_v0  ;;  %675 = vmatpush1.msra.mxu0 %v3026_v36 }
  0x80   :  { %2312 = vmatpush3.msra.mxu1 %v3177_v13  ;;  %676 = vmatprep.subr.mxu0 %v3032_v39 }
  0x81   :  { %2313 = vmatprep.subr.mxu1 %v4064_v0  ;;  %677 = vmatpush1.msra.mxu0 %v3035_v40 }
  0x82   :  { %2314 = vmatpush3.msra.mxu1 %v3183_v14  ;;  %678 = vmatprep.subr.mxu0 %v3038_v41 }
  0x83   :  { %2315 = vmatprep.subr.mxu1 %v4064_v0  ;;  %679 = vmatpush1.msra.mxu0 %v3043_v42 }
  0x84   :  { %2316 = vmatpush3.msra.mxu1 %v3189_v15  ;;  %680 = vmatprep.subr.mxu0 %v3049_v45 }
  0x85   :  { %2317 = vmatprep.subr.mxu1 %v4064_v0  ;;  %681 = vmatpush1.msra.mxu0 %v3052_v46 }
  0x86   :  { %2318 = vmatpush3.msra.mxu1 %v3195_v16  ;;  %682 = vmatprep.subr.mxu0 %v3055_v47 }
  0x87   :  { %2319 = vmatprep.subr.mxu1 %v4064_v0  ;;  %683 = vmatpush1.msra.mxu0 %v3060_v48 }
  0x88   :  { %2320 = vmatpush3.msra.mxu1 %v3201_v17  ;;  %684 = vmatprep.subr.mxu0 %v3066_v51 }
  0x89   :  { %2322 = vmatmul.mubr.f32.vlgmr.msra.gmra.mxu1 %v4064_v0  ;;  %2324 = vmatprep.subr.mxu1 %v4064_v0 }
  0x8a   :  { %2325 = vmatpush3.msra.mxu1 %v3094_v60  ;;  %685 = vmatpush1.msra.mxu0 %v3069_v52 }
  0x8b   :  { %2326 = vmatprep.subr.mxu1 %v4064_v0  ;;  %686 = vmatprep.subr.mxu0 %v3072_v53 }
  0x8c   :  { %2327 = vmatpush3.msra.mxu1 %v3113_v3  ;;  %687 = vmatpush1.msra.mxu0 %v3077_v54 }
  0x8d   :  { %2328 = vmatprep.subr.mxu1 %v4064_v0  ;;  %688 = vmatprep.subr.mxu0 %v3081_v56 }
  0x8e   :  { %2329 = vmatpush3.msra.mxu1 %v3119_v4  ;;  %689 = vmatpush1.msra.mxu0 %v3084_v57 }
  0x8f   :  { %2330 = vmatprep.subr.mxu1 %v4064_v0  ;;  %690 = vmatprep.subr.mxu0 %v3087_v58 }
  0x90   :  { %2331 = vmatpush3.msra.mxu1 %v3125_v5  ;;  %691 = vmatpush1.msra.mxu0 %v3092_v59 }
  0x91   :  { %2332 = vmatprep.subr.mxu1 %v4064_v0  ;;  %692 = vmatprep.subr.mxu0 %v3098_v62 }
  0x92   :  { %2333 = vmatpush3.msra.mxu1 %v3131_v6  ;;  %693 = vmatpush1.msra.mxu0 %v3101_v63 }
  0x93   :  { %2334 = vmatprep.subr.mxu1 %v4064_v0  ;;  %694 = vmatprep.subr.mxu0 %v3106_v1 }
  0x94   :  { %2335 = vmatpush3.msra.mxu1 %v3139_v7  ;;  %695 = vmatpush1.msra.mxu0 %v3111_v2 }
  0x95   :  { %2336 = vmatprep.subr.mxu1 %v4064_v0  ;;  %728 = vmatprep.mubr.f32.mxu0 %v4064_v0 }
  0x96   :  { %2337 = vmatpush3.msra.mxu1 %v3145_v8  ;;  %2356 = vmatprep.mubr.msk.f32.mxu1 %vm2908_vm1, %v4064_v0 }
  0x97   :  { %2338 = vmatprep.subr.mxu1 %v4064_v0  ;;  %844 = vmatprep.subr.mxu0 %v2984_v20 }
  0x98   :  { %2339 = vmatpush3.msra.mxu1 %v3152_v9 }
  0x99   :  { %2340 = vmatprep.subr.mxu1 %v4064_v0 }
  0x9a   :  { %2341 = vmatpush3.msra.mxu1 %v3158_v10 }
  0x9b   :  { %2342 = vmatprep.subr.mxu1 %v4064_v0 }
  0x9c   :  { %2343 = vmatpush3.msra.mxu1 %v3165_v11 }
  0x9d   :  { %2344 = vmatprep.subr.mxu1 %v4064_v0 }
  0x9e   :  { %2345 = vmatpush3.msra.mxu1 %v3171_v12 }
  0x9f   :  { %2346 = vmatprep.subr.mxu1 %v4064_v0 }
  0xa0   :  { %2347 = vmatpush3.msra.mxu1 %v3177_v13 }
  0xa1   :  { %2348 = vmatprep.subr.mxu1 %v4064_v0 }
  0xa2   :  { %2349 = vmatpush3.msra.mxu1 %v3183_v14 }
  0xa3   :  { %2350 = vmatprep.subr.mxu1 %v4064_v0 }
  0xa4   :  { %2351 = vmatpush3.msra.mxu1 %v3189_v15 }
  0xa5   :  { %2352 = vmatprep.subr.mxu1 %v4064_v0 }
  0xa6   :  { %2353 = vmatpush3.msra.mxu1 %v3195_v16 }
  0xa7   :  { %2354 = vmatprep.subr.mxu1 %v4064_v0 }
  0xa8   :  { %2355 = vmatpush3.msra.mxu1 %v3201_v17 }
  0xa9   :  { %2359 = vmatprep.subr.mxu1 %v4064_v0 }
 0x10f   :  { %v239_v26 = vpop.f32.mrf.mxu0 }
 0x111   :  { %v241_v32 = vpop.f32.mrf.mxu0 }
 0x113   :  { %v245_v38 = vpop.f32.mrf.mxu0 }
 0x114   :  { %v3264_v44 = vadd.f32 %v245_v38, %v136_v37 }
 0x115   :  { %v247_v49 = vpop.f32.mrf.mxu0 }
 0x116   :  { %4126 = vst [vmem:[#allocation28_spill] sm:$0xff] %v3264_v44  ;;  %v3266_v50 = vadd.f32 %v247_v49, %v140_v43  ;;  %v143_v49 = vsub.s32 2, %v134_v19 }
 0x117   :  { %v251_v55 = vpop.f32.mrf.mxu0 }
 0x118   :  { %4127 = vst [vmem:[#allocation29_spill] sm:$0xff] %v3266_v50  ;;  %v3268_v61 = vadd.f32 %v251_v55, %v136_v37 }
 0x119   :  { %v253_v0 = vpop.f32.mrf.mxu0 }
 0x11a   :  { %4128 = vst [vmem:[#allocation30_spill] sm:$0xff] %v3268_v61  ;;  %v3270_v18 = vadd.f32 %v253_v0, %v140_v43  ;;  %v144_v0 = vrot.slane %v131_v25, %v143_v49 }
 0x11b   :  { %v257_v20 = vpop.f32.mrf.mxu0 }
 0x11c   :  { %4129 = vst [vmem:[#allocation31_spill] sm:$0xff] %v3270_v18  ;;  %v3272_v17 = vadd.f32 %v257_v20, %v136_v37 }
 0x11d   :  { %v259_v2 = vpop.f32.mrf.mxu0 }
 0x11e   :  { %4130 = vst [vmem:[#allocation32_spill] sm:$0xff] %v3272_v17  ;;  %v3274_v1 = vadd.f32 %v259_v2, %v140_v43  ;;  %v2279_v2 = vpop.f32.mrf.mxu1 }
 0x11f   :  { %v263_v21 = vpop.f32.mrf.mxu0 }
 0x120   :  { %4131 = vst [vmem:[#allocation33_spill] sm:$0xff] %v3274_v1  ;;  %v3276_v16 = vadd.f32 %v263_v21, %v136_v37  ;;  %v3288_v21 = vadd.f32 %v2279_v2, %v144_v0 }
 0x121   :  { %v265_v31 = vpop.f32.mrf.mxu0 }
 0x122   :  { %4132 = vst [vmem:[#allocation34_spill] sm:$0xff] %v3276_v16  ;;  %v3278_v38 = vadd.f32 %v265_v31, %v140_v43 }
 0x123   :  { %v269_v50 = vpop.f32.mrf.mxu0 }
 0x124   :  { %4133 = vst [vmem:[#allocation35_spill] sm:$0xff] %v3278_v38  ;;  %v3280_v44 = vadd.f32 %v269_v50, %v136_v37  ;;  %v240_v38 = vadd.f32 %v239_v26, %v136_v37 }
 0x125   :  { %v271_v55 = vpop.f32.mrf.mxu0 }
 0x126   :  { %4134 = vst [vmem:[#allocation36_spill] sm:$0xff] %v3280_v44  ;;  %v3282_v61 = vadd.f32 %v271_v55, %v140_v43  ;;  %v352_v55 = vpop.f32.mrf.mxu1 }
 0x127   :  { %v275_v18 = vpop.f32.mrf.mxu0 }
 0x128   :  { %4135 = vst [vmem:[#allocation37_spill] sm:$0xff] %v3282_v61  ;;  %v3284_v20 = vadd.f32 %v275_v18, %v136_v37 }
 0x129   :  { %v277_v17 = vpop.f32.mrf.mxu0 }
 0x12a   :  { %4136 = vst [vmem:[#allocation38_spill] sm:$0xff] %v3284_v20  ;;  %v3286_v1 = vadd.f32 %v277_v17, %v140_v43  ;;  %v242_v17 = vadd.f32 %v241_v32, %v140_v43 }
 0x12b   :  { %v281_v16 = vpop.f32.mrf.mxu0 }
 0x12c   :  { %4137 = vst [vmem:[#allocation39_spill] sm:$0xff] %v3286_v1  ;;  %v3290_v31 = vadd.f32 %v281_v16, %v136_v37 }
 0x12d   :  { %v283_v19 = vpop.f32.mrf.mxu0 }
 0x12e   :  { %4138 = vst [vmem:[#allocation40_spill] sm:$0xff] %v3290_v31  ;;  %v3292_v50 = vadd.f32 %v283_v19, %v140_v43  ;;  %v2282_v25 = vpop.f32.mrf.mxu1 }
 0x12f   :  { %v550_v44 = vpop.f32.mrf.mxu0  ;;  %v3294_v18 = vadd.f32 %v2282_v25, %v144_v0 }
 0x130   :  { %4139 = vst [vmem:[#allocation41_spill] sm:$0xff] %v3292_v50  ;;  %v625_v61 = vadd.f32 %v550_v44, %v240_v38  ;;  %v362_v63 = vpop.f32.mrf.mxu1 }
 0x131   :  { %4140 = vst [vmem:[#allocation42_spill] sm:$0xff] %v3294_v18  ;;  %v552_v20 = vpop.f32.mrf.mxu0  ;;  %v3296_v2 = vadd.f32 %v362_v63, %v144_v0  ;;  %v4162_v18 = vld [vmem:[#allocation29_spill] sm:$0xff] }
 0x132   :  { %v2067_v49 = vmul.f32 -1.442695, %v625_v61  ;;  %v626_v16 = vadd.f32 %v552_v20, %v242_v17 }
 0x133   :  { %4141 = vst [vmem:[#allocation43_spill] sm:$0xff] %v3296_v2  ;;  %v2285_v1 = vpop.f32.mrf.mxu1 }
 0x134   :  { %2617 = vpow2.f32 %v2067_v49  ;;  %v3298_v31 = vadd.f32 %v2285_v1, %v144_v0  ;;  %v2068_v50 = vmul.f32 -1.442695, %v626_v16  ;;  %v3309_v1 = vld [vmem:[%s4059_s5] ss:$0 sm:$0xff] }
 0x135   :  { %v372_v26 = vpop.f32.mrf.mxu1 }
 0x136   :  { %4142 = vst [vmem:[#allocation44_spill] sm:$0xff] %v3298_v31  ;;  %v3300_v37 = vadd.f32 %v372_v26, %v144_v0  ;;  %2619 = vpow2.f32 %v2068_v50  ;;  %v353_v26 = vadd.f32 %v352_v55, %v144_v0 }
 0x137   :  { %v2288_v19 = vpop.f32.mrf.mxu1 }
 0x138   :  { %4143 = vst [vmem:[#allocation45_spill] sm:$0xff] %v3300_v37  ;;  %v3302_v44 = vadd.f32 %v2288_v19, %v144_v0 }
 0x139   :  { %v382_v61 = vpop.f32.mrf.mxu1 }
 0x13a   :  { %4144 = vst [vmem:[#allocation46_spill] sm:$0xff] %v3302_v44  ;;  %v3304_v38 = vadd.f32 %v382_v61, %v144_v0  ;;  %v4146_v61 = vlaneseq  ;;  %v4150_v0 = vmov 0.0  }
 0x13c   :  { %4145 = vst [vmem:[#allocation47_spill] sm:$0xff] %v3304_v38  ;;  %v3313_v50 = vand.u32 127, %v4146_v61 }
 0x13e   :  { %vm419_vm2 = vcmp.ge.s32.totalorder %v3313_v50, 32  ;;  %vm420_vm3 = vcmp.lt.s32.totalorder %v3313_v50, 64  ;;  %vm418_vm7 = vcmp.lt.s32.totalorder %v3313_v50, 32 }
 0x13f   :  { %vm3320_vm5 = vmand %vm419_vm2, %vm420_vm3 }
 0x141   :  { %v2618_v25 = vpop.eup %2617 }
 0x142   :  { %v633_v32 = vadd.f32 1.0, %v2618_v25  ;;  %v3315_v25 = vld [vmem:[#allocation6] sm:$0xff] }
 0x143   :  { %v2620_v63 = vpop.eup %2619  ;;  %vm650_vm4 = vcmp.gt.f32.partialorder %v3315_v25, 7.0  ;;  %vm647_vm6 = vcmp.gt.f32.partialorder %v3315_v25, 0.0  ;;  %vm830_vm8 = vcmp.gt.f32.partialorder %v3315_v25, 6.0  ;;  %vm827_vm9 = vcmp.gt.f32.partialorder %v3315_v25, 1.0 }
 0x144   :  { %2621 = vrcp.f32 %v633_v32  ;;  %v634_v49 = vadd.f32 1.0, %v2620_v63  ;;  %v4147_v63 = vmov 0  ;;  %v3326_v55 = vsel %vm650_vm4, 1.0, %v4150_v0 }
 0x145   :  { %v4148_v63 = vsel %vm3320_vm5, 4294967295, %v4147_v63  ;;  %4151 = vst [vmem:[#allocation49_spill] sm:$0xff] %v3326_v55  ;;  %vm1010_vm10 = vcmp.gt.f32.partialorder %v3315_v25, 5.0  ;;  %vm1007_vm11 = vcmp.gt.f32.partialorder %v3315_v25, 2.0  ;;  %vm1190_vm12 = vcmp.gt.f32.partialorder %v3315_v25, 4.0 }
 0x146   :  { %2623 = vrcp.f32 %v634_v49  ;;  %4149 = vst [vmem:[#allocation48_spill] sm:$0xff] %v4148_v63  ;;  %vm1187_vm13 = vcmp.gt.f32.partialorder %v3315_v25, 3.0 }
 0x149   :  { %v621_v43 = vpop.f32.mrf.mxu1 }
 0x14a   :  { %v639_v17 = vadd.f32 %v3309_v1, %v621_v43  ;;  %v3330_v43 = vsel %vm647_vm6, 1.0, %v4150_v0 }
 0x14b   :  { %v2323_v20 = vpop.f32.mrf.mxu1  ;;  %4152 = vst [vmem:[#allocation50_spill] sm:$0xff] %v3330_v43 }
 0x14c   :  { %v653_v20 = vsel %vm3320_vm5, %v3326_v55, 0.0 }
 0x151   :  { %v2622_v16 = vpop.eup %2621 }
 0x152   :  { %v640_v19 = vmul.f32 %v2622_v16, %v639_v17  ;;  %v654_v17 = vsel %vm418_vm7, %v3330_v43, %v653_v20  ;;  %v4157_v20 = vld [vmem:[#allocation23_spill] sm:$0xff] }
 0x153   :  { %v2624_v49 = vpop.eup %2623 }
 0x154   :  { %v641_v32 = vadd.f32 %v640_v19, %v353_v26  ;;  %v643_v16 = vsub.f32 1.0, %v2624_v49  ;;  %v656_v26 = vsub.f32 1.0, %v654_v17 }
 0x156   :  { %2625 = vtanh.f32 %v641_v32  ;;  %v645_v32 = vmul.f32 0.0, %v2624_v49  ;;  %v657_v38 = vmul.f32 0.0, %v656_v26  ;;  %v4158_v49 = vld [vmem:[#allocation24_spill] sm:$0xff] }
 0x163   :  { %v2626_v19 = vpop.eup %2625 }
 0x164   :  { %v644_v61 = vmul.f32 %v2626_v19, %v643_v16  ;;  %v4160_v16 = vld [vmem:[#allocation20_spill] sm:$0xff] }
 0x166   :  { %v646_v44 = vadd.f32 %v645_v32, %v644_v61  ;;  %v4161_v61 = vld [vmem:[#allocation28_spill] sm:$0xff] }
 0x168   :  { %v3338_v31 = vmul.f32 %v654_v17, %v646_v44  ;;  %v4155_v44 = vld [vmem:[#allocation22_spill] sm:$0xff]  ;;  %v4159_v17 = vld [vmem:[#allocation27_spill] sm:$0xff] }
 0x16a   :  { %4153 = vst [vmem:[#allocation51_spill] sm:$0xff] %v3338_v31  ;;  %v3341_v37 = vadd.f32 %v657_v38, %v3338_v31  ;;  %v4156_v38 = vld [vmem:[#allocation26_spill] sm:$0xff] }
 0x16c   :  { %4154 = vst [vmem:[#allocation52_spill] sm:$0xff] %v3341_v37  ;;  %729 = vmatmul.mubr.f32.vlgmr.msra.gmra.mxu0 %v3341_v37  ;;  %2357 = vmatmul.mubr.f32.vlgmr.msra.gmra.mxu1 %v3341_v37 }
 0x16d   :  { %845 = vmatpush1.msra.mxu0 %v2986_v22  ;;  %2360 = vmatpush3.msra.mxu1 %v3094_v60 }
 0x16e   :  { %846 = vmatprep.subr.mxu0 %v2988_v23  ;;  %2361 = vmatprep.subr.mxu1 %v4150_v0 }
 0x16f   :  { %847 = vmatpush1.msra.mxu0 %v2992_v24  ;;  %2362 = vmatpush3.msra.mxu1 %v3113_v3 }
 0x170   :  { %848 = vmatprep.subr.mxu0 %v2998_v27  ;;  %2363 = vmatprep.subr.mxu1 %v4150_v0 }
 0x171   :  { %849 = vmatpush1.msra.mxu0 %v3001_v28  ;;  %2364 = vmatpush3.msra.mxu1 %v3119_v4 }
 0x172   :  { %850 = vmatprep.subr.mxu0 %v3004_v29  ;;  %2365 = vmatprep.subr.mxu1 %v4150_v0 }
 0x173   :  { %851 = vmatpush1.msra.mxu0 %v3009_v30  ;;  %2366 = vmatpush3.msra.mxu1 %v3125_v5 }
 0x174   :  { %852 = vmatprep.subr.mxu0 %v3015_v33  ;;  %2367 = vmatprep.subr.mxu1 %v4150_v0 }
 0x175   :  { %853 = vmatpush1.msra.mxu0 %v3018_v34  ;;  %2368 = vmatpush3.msra.mxu1 %v3131_v6 }
 0x176   :  { %854 = vmatprep.subr.mxu0 %v3021_v35  ;;  %2369 = vmatprep.subr.mxu1 %v4150_v0 }
 0x177   :  { %855 = vmatpush1.msra.mxu0 %v3026_v36  ;;  %2370 = vmatpush3.msra.mxu1 %v3139_v7 }
 0x178   :  { %856 = vmatprep.subr.mxu0 %v3032_v39  ;;  %2371 = vmatprep.subr.mxu1 %v4150_v0 }
 0x179   :  { %857 = vmatpush1.msra.mxu0 %v3035_v40  ;;  %2372 = vmatpush3.msra.mxu1 %v3145_v8 }
 0x17a   :  { %858 = vmatprep.subr.mxu0 %v3038_v41  ;;  %2373 = vmatprep.subr.mxu1 %v4150_v0 }
 0x17b   :  { %859 = vmatpush1.msra.mxu0 %v3043_v42  ;;  %2374 = vmatpush3.msra.mxu1 %v3152_v9 }
 0x17c   :  { %860 = vmatprep.subr.mxu0 %v3049_v45  ;;  %2375 = vmatprep.subr.mxu1 %v4150_v0 }
 0x17d   :  { %861 = vmatpush1.msra.mxu0 %v3052_v46  ;;  %2376 = vmatpush3.msra.mxu1 %v3158_v10 }
 0x17e   :  { %862 = vmatprep.subr.mxu0 %v3055_v47  ;;  %2377 = vmatprep.subr.mxu1 %v4150_v0 }
 0x17f   :  { %863 = vmatpush1.msra.mxu0 %v3060_v48  ;;  %2378 = vmatpush3.msra.mxu1 %v3165_v11 }
 0x180   :  { %864 = vmatprep.subr.mxu0 %v3066_v51  ;;  %2379 = vmatprep.subr.mxu1 %v4150_v0 }
 0x181   :  { %865 = vmatpush1.msra.mxu0 %v3069_v52  ;;  %2380 = vmatpush3.msra.mxu1 %v3171_v12 }
 0x182   :  { %866 = vmatprep.subr.mxu0 %v3072_v53  ;;  %2381 = vmatprep.subr.mxu1 %v4150_v0 }
 0x183   :  { %867 = vmatpush1.msra.mxu0 %v3077_v54  ;;  %2382 = vmatpush3.msra.mxu1 %v3177_v13 }
 0x184   :  { %868 = vmatprep.subr.mxu0 %v3081_v56  ;;  %2383 = vmatprep.subr.mxu1 %v4150_v0 }
 0x185   :  { %869 = vmatpush1.msra.mxu0 %v3084_v57  ;;  %2384 = vmatpush3.msra.mxu1 %v3183_v14 }
 0x186   :  { %870 = vmatprep.subr.mxu0 %v3087_v58  ;;  %2385 = vmatprep.subr.mxu1 %v4150_v0 }
 0x187   :  { %871 = vmatpush1.msra.mxu0 %v3092_v59  ;;  %2386 = vmatpush3.msra.mxu1 %v3189_v15 }
 0x188   :  { %872 = vmatprep.subr.mxu0 %v3098_v62  ;;  %2387 = vmatprep.subr.mxu1 %v4150_v0 }
 0x189   :  { %873 = vmatpush1.msra.mxu0 %v4155_v44  ;;  %2388 = vmatpush3.msra.mxu1 %v4156_v38 }
 0x18a   :  { %874 = vmatprep.subr.mxu0 %v4157_v20  ;;  %2389 = vmatprep.subr.mxu1 %v4150_v0 }
 0x18b   :  { %875 = vmatpush1.msra.mxu0 %v4158_v49  ;;  %908 = vmatprep.mubr.f32.mxu0 %v4150_v0 }
 0x18c   :  { %2390 = vmatpush3.msra.mxu1 %v4159_v17  ;;  %2391 = vmatprep.mubr.msk.f32.mxu1 %vm2908_vm1, %v4150_v0 }
 0x18d   :  { %1024 = vmatprep.subr.mxu0 %v4160_v16  ;;  %2394 = vmatprep.subr.mxu1 %v4150_v0 }
 0x22c   :  { %v730_v26 = vpop.f32.mrf.mxu0  ;;  %v801_v19 = vpop.f32.mrf.mxu1 }
 0x22d   :  { %v805_v32 = vadd.f32 %v730_v26, %v4161_v61  ;;  %v819_v16 = vadd.f32 %v3309_v1, %v801_v19 }
 0x22e   :  { %v2358_v31 = vpop.f32.mrf.mxu1  ;;  %v732_v43 = vpop.f32.mrf.mxu0 }
 0x22f   :  { %v2071_v55 = vmul.f32 -1.442695, %v805_v32  ;;  %v806_v2 = vadd.f32 %v732_v43, %v4162_v18  ;;  %v3419_v31 = vsel %vm830_vm8, 1.0, %v4150_v0  ;;  %v3422_v18 = vsel %vm827_vm9, 1.0, %v4150_v0  ;;  %v4177_v32 = vld [vmem:[#allocation43_spill] sm:$0xff] }
 0x230   :  { %4163 = vst [vmem:[#allocation28_spill] sm:$0xff] %v3419_v31  ;;  %4164 = vst [vmem:[#allocation29_spill] sm:$0xff] %v3422_v18 }
 0x231   :  { %2627 = vpow2.f32 %v2071_v55  ;;  %v2072_v49 = vmul.f32 -1.442695, %v806_v2  ;;  %v833_v2 = vsel %vm3320_vm5, %v3419_v31, 0.0  ;;  %v4195_v31 = vld [vmem:[#allocation34_spill] sm:$0xff] }
 0x233   :  { %2629 = vpow2.f32 %v2072_v49 }
 0x23e   :  { %v2628_v17 = vpop.eup %2627 }
 0x23f   :  { %v813_v20 = vadd.f32 1.0, %v2628_v17 }
 0x240   :  { %v2630_v38 = vpop.eup %2629 }
 0x241   :  { %2631 = vrcp.f32 %v813_v20  ;;  %v814_v44 = vadd.f32 1.0, %v2630_v38 }
 0x243   :  { %2633 = vrcp.f32 %v814_v44 }
 0x24e   :  { %v2632_v62 = vpop.eup %2631 }
 0x24f   :  { %v820_v15 = vmul.f32 %v2632_v62, %v819_v16  ;;  %v834_v62 = vsel %vm418_vm7, %v3422_v18, %v833_v2  ;;  %v3513_v2 = vsel %vm1010_vm10, 1.0, %v4150_v0 }
 0x250   :  { %v2634_v55 = vpop.eup %2633  ;;  %v836_v38 = vsub.f32 1.0, %v834_v62 }
 0x251   :  { %v821_v26 = vadd.f32 %v820_v15, %v3288_v21  ;;  %v823_v15 = vsub.f32 1.0, %v2634_v55  ;;  %v825_v44 = vmul.f32 %v2634_v55, %v3341_v37  ;;  %v3516_v55 = vsel %vm1007_vm11, 1.0, %v4150_v0 }
 0x252   :  { %v837_v17 = vmul.f32 %v836_v38, %v3341_v37  ;;  %v3783_v37 = vld [vmem:[#allocation9 + $0x10] sm:$0xff] }
 0x253   :  { %2635 = vtanh.f32 %v821_v26 }
 0x260   :  { %v2636_v21 = vpop.eup %2635 }
 0x261   :  { %v824_v43 = vmul.f32 %v2636_v21, %v823_v15 }
 0x263   :  { %v826_v20 = vadd.f32 %v825_v44, %v824_v43 }
 0x265   :  { %v3431_v49 = vmul.f32 %v834_v62, %v826_v20  ;;  %v1013_v62 = vsel %vm3320_vm5, %v3513_v2, 0.0 }
 0x266   :  { %v1014_v21 = vsel %vm418_vm7, %v3516_v55, %v1013_v62 }
 0x267   :  { %4165 = vst [vmem:[#allocation53_spill] sm:$0xff] %v3431_v49  ;;  %v3435_v16 = vadd.f32 %v837_v17, %v3431_v49  ;;  %v1016_v17 = vsub.f32 1.0, %v1014_v21 }
 0x269   :  { %4166 = vst [vmem:[#allocation54_spill] sm:$0xff] %v3435_v16  ;;  %909 = vmatmul.mubr.f32.vlgmr.msra.gmra.mxu0 %v3435_v16  ;;  %2392 = vmatmul.mubr.f32.vlgmr.msra.gmra.mxu1 %v3435_v16 }
 0x26a   :  { %1025 = vmatpush1.msra.mxu0 %v2986_v22  ;;  %2395 = vmatpush3.msra.mxu1 %v3094_v60  ;;  %v4167_v22 = vld [vmem:[#allocation25_spill] sm:$0xff] }
 0x26b   :  { %1026 = vmatprep.subr.mxu0 %v2988_v23  ;;  %2396 = vmatprep.subr.mxu1 %v4150_v0  ;;  %v4168_v23 = vld [vmem:[#allocation21_spill] sm:$0xff]  ;;  %4178 = vst [vmem:[#allocation25_spill] sm:$0xff] %v3513_v2 }
 0x26c   :  { %1027 = vmatpush1.msra.mxu0 %v2992_v24  ;;  %2397 = vmatpush3.msra.mxu1 %v3113_v3  ;;  %v4169_v24 = vld [vmem:[#allocation22_spill] sm:$0xff]  ;;  %4179 = vst [vmem:[#allocation21_spill] sm:$0xff] %v3516_v55  ;;  %v4196_v55 = vld [vmem:[#allocation35_spill] sm:$0xff] }
 0x26d   :  { %1028 = vmatprep.subr.mxu0 %v2998_v27  ;;  %2398 = vmatprep.subr.mxu1 %v4150_v0  ;;  %v4170_v27 = vld [vmem:[#allocation26_spill] sm:$0xff] }
 0x26e   :  { %1029 = vmatpush1.msra.mxu0 %v3001_v28  ;;  %2399 = vmatpush3.msra.mxu1 %v3119_v4  ;;  %v4171_v28 = vld [vmem:[#allocation23_spill] sm:$0xff] }
 0x26f   :  { %1030 = vmatprep.subr.mxu0 %v3004_v29  ;;  %2400 = vmatprep.subr.mxu1 %v4150_v0  ;;  %v4172_v29 = vld [vmem:[#allocation24_spill] sm:$0xff] }
 0x270   :  { %1031 = vmatpush1.msra.mxu0 %v3009_v30  ;;  %2401 = vmatpush3.msra.mxu1 %v3125_v5  ;;  %v4173_v30 = vld [vmem:[#allocation27_spill] sm:$0xff] }
 0x271   :  { %1032 = vmatprep.subr.mxu0 %v3015_v33  ;;  %2402 = vmatprep.subr.mxu1 %v4150_v0  ;;  %v4174_v33 = vld [vmem:[#allocation20_spill] sm:$0xff] }
 0x272   :  { %1033 = vmatpush1.msra.mxu0 %v3018_v34  ;;  %2403 = vmatpush3.msra.mxu1 %v3131_v6 }
 0x273   :  { %1034 = vmatprep.subr.mxu0 %v3021_v35  ;;  %2404 = vmatprep.subr.mxu1 %v4150_v0 }
 0x274   :  { %1035 = vmatpush1.msra.mxu0 %v3026_v36  ;;  %2405 = vmatpush3.msra.mxu1 %v3139_v7  ;;  %v4175_v36 = vld [vmem:[#allocation30_spill] sm:$0xff] }
 0x275   :  { %1036 = vmatprep.subr.mxu0 %v3032_v39  ;;  %2406 = vmatprep.subr.mxu1 %v4150_v0 }
 0x276   :  { %1037 = vmatpush1.msra.mxu0 %v3035_v40  ;;  %2407 = vmatpush3.msra.mxu1 %v3145_v8 }
 0x277   :  { %1038 = vmatprep.subr.mxu0 %v3038_v41  ;;  %2408 = vmatprep.subr.mxu1 %v4150_v0 }
 0x278   :  { %1039 = vmatpush1.msra.mxu0 %v3043_v42  ;;  %2409 = vmatpush3.msra.mxu1 %v3152_v9 }
 0x279   :  { %1040 = vmatprep.subr.mxu0 %v3049_v45  ;;  %2410 = vmatprep.subr.mxu1 %v4150_v0  ;;  %v4176_v45 = vld [vmem:[#allocation31_spill] sm:$0xff] }
 0x27a   :  { %1041 = vmatpush1.msra.mxu0 %v3052_v46  ;;  %2411 = vmatpush3.msra.mxu1 %v3158_v10 }
 0x27b   :  { %1042 = vmatprep.subr.mxu0 %v3055_v47  ;;  %2412 = vmatprep.subr.mxu1 %v4150_v0 }
 0x27c   :  { %1043 = vmatpush1.msra.mxu0 %v3060_v48  ;;  %2413 = vmatpush3.msra.mxu1 %v3165_v11 }
 0x27d   :  { %1044 = vmatprep.subr.mxu0 %v3066_v51  ;;  %2414 = vmatprep.subr.mxu1 %v4150_v0 }
 0x27e   :  { %1045 = vmatpush1.msra.mxu0 %v3069_v52  ;;  %2415 = vmatpush3.msra.mxu1 %v3171_v12 }
 0x27f   :  { %1046 = vmatprep.subr.mxu0 %v3072_v53  ;;  %2416 = vmatprep.subr.mxu1 %v4150_v0 }
 0x280   :  { %1047 = vmatpush1.msra.mxu0 %v3077_v54  ;;  %2417 = vmatpush3.msra.mxu1 %v3177_v13 }
 0x281   :  { %1048 = vmatprep.subr.mxu0 %v3081_v56  ;;  %2418 = vmatprep.subr.mxu1 %v4150_v0 }
 0x282   :  { %1049 = vmatpush1.msra.mxu0 %v3084_v57  ;;  %2419 = vmatpush3.msra.mxu1 %v3183_v14 }
 0x283   :  { %1050 = vmatprep.subr.mxu0 %v3087_v58  ;;  %2420 = vmatprep.subr.mxu1 %v4150_v0 }
 0x284   :  { %1051 = vmatpush1.msra.mxu0 %v3092_v59  ;;  %2421 = vmatpush3.msra.mxu1 %v4167_v22 }
 0x285   :  { %1052 = vmatprep.subr.mxu0 %v4168_v23  ;;  %2422 = vmatprep.subr.mxu1 %v4150_v0 }
 0x286   :  { %1053 = vmatpush1.msra.mxu0 %v4169_v24  ;;  %2423 = vmatpush3.msra.mxu1 %v4170_v27 }
 0x287   :  { %1054 = vmatprep.subr.mxu0 %v4171_v28  ;;  %2424 = vmatprep.subr.mxu1 %v4150_v0 }
 0x288   :  { %1055 = vmatpush1.msra.mxu0 %v4172_v29  ;;  %1088 = vmatprep.mubr.f32.mxu0 %v4150_v0 }
 0x289   :  { %2425 = vmatpush3.msra.mxu1 %v4173_v30  ;;  %2426 = vmatprep.mubr.msk.f32.mxu1 %vm2908_vm1, %v4150_v0 }
 0x28a   :  { %1204 = vmatprep.subr.mxu0 %v4174_v33  ;;  %2429 = vmatprep.subr.mxu1 %v4150_v0 }
 0x329   :  { %v910_v34 = vpop.f32.mrf.mxu0  ;;  %v981_v35 = vpop.f32.mrf.mxu1 }
 0x32a   :  { %v985_v39 = vadd.f32 %v910_v34, %v4175_v36  ;;  %v999_v54 = vadd.f32 %v3309_v1, %v981_v35  ;;  %v1017_v35 = vmul.f32 %v1016_v17, %v3435_v16 }
 0x32b   :  { %v2393_v40 = vpop.f32.mrf.mxu1  ;;  %v912_v42 = vpop.f32.mrf.mxu0 }
 0x32c   :  { %v2075_v41 = vmul.f32 -1.442695, %v985_v39  ;;  %v986_v46 = vadd.f32 %v912_v42, %v4176_v45  ;;  %v3533_v39 = vld [vmem:[#allocation9 + $0x168] sm:$0xff]  ;;  %v3537_v40 = vld [vmem:[#allocation9 + $0x158] sm:$0xff]  ;;  %v3545_v42 = vld [vmem:[#allocation9 + $0x140] sm:$0xff] }
 0x32d   :  { %v3549_v45 = vld [vmem:[#allocation9 + $0x138] sm:$0xff] }
 0x32e   :  { %2637 = vpow2.f32 %v2075_v41  ;;  %v2076_v47 = vmul.f32 -1.442695, %v986_v46  ;;  %v3541_v41 = vld [vmem:[#allocation9 + $0x150] sm:$0xff]  ;;  %v3557_v46 = vld [vmem:[#allocation9 + $0x120] sm:$0xff] }
 0x330   :  { %2639 = vpow2.f32 %v2076_v47  ;;  %v3565_v47 = vld [vmem:[#allocation9 + $0x108] sm:$0xff] }
 0x33b   :  { %v2638_v48 = vpop.eup %2637 }
 0x33c   :  { %v993_v51 = vadd.f32 1.0, %v2638_v48  ;;  %v3573_v48 = vld [vmem:[#allocation9 + $0xf0] sm:$0xff] }
 0x33d   :  { %v2640_v52 = vpop.eup %2639 }
 0x33e   :  { %2641 = vrcp.f32 %v993_v51  ;;  %v994_v53 = vadd.f32 1.0, %v2640_v52  ;;  %v3581_v51 = vld [vmem:[#allocation9 + $0xd8] sm:$0xff]  ;;  %v3589_v52 = vld [vmem:[#allocation9 + $0xc0] sm:$0xff] }
 0x340   :  { %2643 = vrcp.f32 %v994_v53  ;;  %v3597_v53 = vld [vmem:[#allocation9 + $0xa8] sm:$0xff] }
 0x34b   :  { %v2642_v19 = vpop.eup %2641 }
 0x34c   :  { %v1000_v61 = vmul.f32 %v2642_v19, %v999_v54  ;;  %v3605_v54 = vld [vmem:[#allocation9 + $0x90] sm:$0xff]  ;;  %v3613_v19 = vld [vmem:[#allocation9 + $0x78] sm:$0xff] }
 0x34d   :  { %v2644_v15 = vpop.eup %2643 }
 0x34e   :  { %v1001_v26 = vadd.f32 %v1000_v61, %v4177_v32  ;;  %v1003_v43 = vsub.f32 1.0, %v2644_v15  ;;  %v1005_v20 = vmul.f32 %v2644_v15, %v3435_v16  ;;  %v3621_v61 = vld [vmem:[#allocation9 + $0x60] sm:$0xff]  ;;  %v4185_v15 = vld [vmem:[#allocation42_spill] sm:$0xff] }
 0x34f   :  { %4194 = vst [vmem:[#allocation42_spill] sm:$0xff] %v3783_v37 }
 0x350   :  { %2645 = vtanh.f32 %v1001_v26 }
 0x35d   :  { %v2646_v44 = vpop.eup %2645 }
 0x35e   :  { %v1004_v38 = vmul.f32 %v2646_v44, %v1003_v43  ;;  %v3655_v43 = vsel %vm1190_vm12, 1.0, %v4150_v0  ;;  %v3658_v44 = vsel %vm1187_vm13, 1.0, %v4150_v0 }
 0x360   :  { %v1006_v33 = vadd.f32 %v1005_v20, %v1004_v38  ;;  %v1193_v38 = vsel %vm3320_vm5, %v3655_v43, 0.0 }
 0x361   :  { %v1194_v17 = vsel %vm418_vm7, %v3658_v44, %v1193_v38  ;;  %v3749_v38 = vld [vmem:[#allocation9 + $0x48] sm:$0xff] }
 0x362   :  { %v3525_v34 = vmul.f32 %v1014_v21, %v1006_v33 }
 0x364   :  { %4180 = vst [vmem:[#allocation22_spill] sm:$0xff] %v3525_v34  ;;  %v3529_v36 = vadd.f32 %v1017_v35, %v3525_v34 }
 0x366   :  { %4181 = vst [vmem:[#allocation26_spill] sm:$0xff] %v3529_v36  ;;  %1089 = vmatmul.mubr.f32.vlgmr.msra.gmra.mxu0 %v3529_v36  ;;  %2427 = vmatmul.mubr.f32.vlgmr.msra.gmra.mxu1 %v3529_v36 }
 0x367   :  { %1205 = vmatpush1.msra.mxu0 %v3533_v39  ;;  %2430 = vmatpush3.msra.mxu1 %v3094_v60  ;;  %v3553_v60 = vld [vmem:[#allocation9 + $0x128] sm:$0xff] }
 0x368   :  { %1206 = vmatprep.subr.mxu0 %v3537_v40  ;;  %2431 = vmatprep.subr.mxu1 %v4150_v0 }
 0x369   :  { %1207 = vmatpush1.msra.mxu0 %v3541_v41  ;;  %2432 = vmatpush3.msra.mxu1 %v3113_v3  ;;  %v3561_v3 = vld [vmem:[#allocation9 + $0x110] sm:$0xff] }
 0x36a   :  { %1208 = vmatprep.subr.mxu0 %v3545_v42  ;;  %2433 = vmatprep.subr.mxu1 %v4150_v0 }
 0x36b   :  { %1209 = vmatpush1.msra.mxu0 %v3549_v45  ;;  %2434 = vmatpush3.msra.mxu1 %v3119_v4  ;;  %v3569_v4 = vld [vmem:[#allocation9 + $0xf8] sm:$0xff] }
 0x36c   :  { %1210 = vmatprep.subr.mxu0 %v3553_v60  ;;  %2435 = vmatprep.subr.mxu1 %v4150_v0  ;;  %v4215_v63 = vld [vmem:[#allocation22_spill] sm:$0xff] }
 0x36d   :  { %1211 = vmatpush1.msra.mxu0 %v3557_v46  ;;  %2436 = vmatpush3.msra.mxu1 %v3125_v5  ;;  %v3577_v5 = vld [vmem:[#allocation9 + $0xe0] sm:$0xff] }
 0x36e   :  { %1212 = vmatprep.subr.mxu0 %v3561_v3  ;;  %2437 = vmatprep.subr.mxu1 %v4150_v0 }
 0x36f   :  { %1213 = vmatpush1.msra.mxu0 %v3565_v47  ;;  %2438 = vmatpush3.msra.mxu1 %v3131_v6  ;;  %v3585_v6 = vld [vmem:[#allocation9 + $0xc8] sm:$0xff] }
 0x370   :  { %1214 = vmatprep.subr.mxu0 %v3569_v4  ;;  %2439 = vmatprep.subr.mxu1 %v4150_v0 }
 0x371   :  { %1215 = vmatpush1.msra.mxu0 %v3573_v48  ;;  %2440 = vmatpush3.msra.mxu1 %v3139_v7  ;;  %v3593_v7 = vld [vmem:[#allocation9 + $0xb0] sm:$0xff] }
 0x372   :  { %1216 = vmatprep.subr.mxu0 %v3577_v5  ;;  %2441 = vmatprep.subr.mxu1 %v4150_v0 }
 0x373   :  { %1217 = vmatpush1.msra.mxu0 %v3581_v51  ;;  %2442 = vmatpush3.msra.mxu1 %v3145_v8  ;;  %v3601_v8 = vld [vmem:[#allocation9 + $0x98] sm:$0xff] }
 0x374   :  { %1218 = vmatprep.subr.mxu0 %v3585_v6  ;;  %2443 = vmatprep.subr.mxu1 %v4150_v0 }
 0x375   :  { %1219 = vmatpush1.msra.mxu0 %v3589_v52  ;;  %2444 = vmatpush3.msra.mxu1 %v3152_v9  ;;  %v3609_v9 = vld [vmem:[#allocation9 + $0x80] sm:$0xff] }
 0x376   :  { %1220 = vmatprep.subr.mxu0 %v3593_v7  ;;  %2445 = vmatprep.subr.mxu1 %v4150_v0 }
 0x377   :  { %1221 = vmatpush1.msra.mxu0 %v3597_v53  ;;  %2446 = vmatpush3.msra.mxu1 %v3158_v10  ;;  %v3617_v10 = vld [vmem:[#allocation9 + $0x68] sm:$0xff] }
 0x378   :  { %1222 = vmatprep.subr.mxu0 %v3601_v8  ;;  %2447 = vmatprep.subr.mxu1 %v4150_v0 }
 0x379   :  { %1223 = vmatpush1.msra.mxu0 %v3605_v54  ;;  %2448 = vmatpush3.msra.mxu1 %v3165_v11 }
 0x37a   :  { %1224 = vmatprep.subr.mxu0 %v3609_v9  ;;  %2449 = vmatprep.subr.mxu1 %v4150_v0 }
 0x37b   :  { %1225 = vmatpush1.msra.mxu0 %v3613_v19  ;;  %2450 = vmatpush3.msra.mxu1 %v3171_v12 }
 0x37c   :  { %1226 = vmatprep.subr.mxu0 %v3617_v10  ;;  %2451 = vmatprep.subr.mxu1 %v4150_v0 }
 0x37d   :  { %1227 = vmatpush1.msra.mxu0 %v3621_v61  ;;  %2452 = vmatpush3.msra.mxu1 %v3177_v13 }
 0x37e   :  { %1228 = vmatprep.subr.mxu0 %v3081_v56  ;;  %2453 = vmatprep.subr.mxu1 %v4150_v0  ;;  %v3644_v56 = vld [vmem:[#allocation9 + $0x170] sm:$0xff] }
 0x37f   :  { %1229 = vmatpush1.msra.mxu0 %v3084_v57  ;;  %2454 = vmatpush3.msra.mxu1 %v3183_v14  ;;  %4182 = vst [vmem:[#allocation23_spill] sm:$0xff] %v3644_v56 }
 0x380   :  { %1230 = vmatprep.subr.mxu0 %v3087_v58  ;;  %2455 = vmatprep.subr.mxu1 %v4150_v0 }
 0x381   :  { %1231 = vmatpush1.msra.mxu0 %v3092_v59  ;;  %2456 = vmatpush3.msra.mxu1 %v4167_v22  ;;  %v4183_v59 = vld [vmem:[#allocation32_spill] sm:$0xff]  ;;  %v4184_v22 = vld [vmem:[#allocation33_spill] sm:$0xff] }
 0x382   :  { %1232 = vmatprep.subr.mxu0 %v4168_v23  ;;  %2457 = vmatprep.subr.mxu1 %v4150_v0 }
 0x383   :  { %1233 = vmatpush1.msra.mxu0 %v4169_v24  ;;  %2458 = vmatpush3.msra.mxu1 %v4170_v27 }
 0x384   :  { %1234 = vmatprep.subr.mxu0 %v4171_v28  ;;  %2459 = vmatprep.subr.mxu1 %v4150_v0 }
 0x385   :  { %1235 = vmatpush1.msra.mxu0 %v4172_v29  ;;  %1268 = vmatprep.mubr.f32.mxu0 %v4150_v0 }
 0x386   :  { %2460 = vmatpush3.msra.mxu1 %v4173_v30  ;;  %2461 = vmatprep.mubr.msk.f32.mxu1 %vm2908_vm1, %v4150_v0 }
 0x387   :  { %1378 = vmatprep.subr.mxu0 %v3644_v56  ;;  %2464 = vmatprep.subr.mxu1 %v4150_v0 }
 0x426   :  { %v1090_v57 = vpop.f32.mrf.mxu0  ;;  %v1161_v58 = vpop.f32.mrf.mxu1 }
 0x427   :  { %v1165_v11 = vadd.f32 %v1090_v57, %v4183_v59  ;;  %v1179_v32 = vadd.f32 %v3309_v1, %v1161_v58  ;;  %v1196_v58 = vsub.f32 1.0, %v1194_v17 }
 0x428   :  { %v2428_v12 = vpop.f32.mrf.mxu1  ;;  %v1092_v14 = vpop.f32.mrf.mxu0 }
 0x429   :  { %v2079_v13 = vmul.f32 -1.442695, %v1165_v11  ;;  %v1166_v23 = vadd.f32 %v1092_v14, %v4184_v22  ;;  %v1197_v12 = vmul.f32 %v1196_v58, %v3529_v36  ;;  %v3676_v14 = vld [vmem:[#allocation9 + $0x178] sm:$0xff]  ;;  %v3682_v22 = vld [vmem:[#allocation9 + $0x160] sm:$0xff]  ;;  %v3772_v58 = vld [vmem:[#allocation9 + $0x28] sm:$0xff] }
 0x42a   :  { %4191 = vst [vmem:[#allocation43_spill] sm:$0xff] %v3772_v58 }
 0x42b   :  { %2647 = vpow2.f32 %v2079_v13  ;;  %v2080_v24 = vmul.f32 -1.442695, %v1166_v23  ;;  %v3688_v23 = vld [vmem:[#allocation9 + $0x148] sm:$0xff] }
 0x42d   :  { %2649 = vpow2.f32 %v2080_v24  ;;  %v3694_v24 = vld [vmem:[#allocation9 + $0x130] sm:$0xff] }
 0x438   :  { %v2648_v27 = vpop.eup %2647 }
 0x439   :  { %v1173_v28 = vadd.f32 1.0, %v2648_v27  ;;  %v3700_v27 = vld [vmem:[#allocation9 + $0x118] sm:$0xff] }
 0x43a   :  { %v2650_v29 = vpop.eup %2649 }
 0x43b   :  { %2651 = vrcp.f32 %v1173_v28  ;;  %v1174_v30 = vadd.f32 1.0, %v2650_v29  ;;  %v3706_v28 = vld [vmem:[#allocation9 + $0x100] sm:$0xff]  ;;  %v3712_v29 = vld [vmem:[#allocation9 + $0xe8] sm:$0xff] }
 0x43d   :  { %2653 = vrcp.f32 %v1174_v30  ;;  %v3718_v30 = vld [vmem:[#allocation9 + $0xd0] sm:$0xff] }
 0x448   :  { %v2652_v26 = vpop.eup %2651 }
 0x449   :  { %v1180_v62 = vmul.f32 %v2652_v26, %v1179_v32  ;;  %v3724_v32 = vld [vmem:[#allocation9 + $0xb8] sm:$0xff]  ;;  %v3730_v26 = vld [vmem:[#allocation9 + $0xa0] sm:$0xff] }
 0x44a   :  { %v2654_v20 = vpop.eup %2653 }
 0x44b   :  { %v1181_v21 = vadd.f32 %v1180_v62, %v4185_v15  ;;  %v1183_v33 = vsub.f32 1.0, %v2654_v20  ;;  %v1185_v25 = vmul.f32 %v2654_v20, %v3529_v36  ;;  %v3736_v62 = vld [vmem:[#allocation9 + $0x88] sm:$0xff]  ;;  %v3742_v15 = vld [vmem:[#allocation9 + $0x70] sm:$0xff]  ;;  %v3752_v20 = vld [vmem:[#allocation9 + $0x58] sm:$0xff] }
 0x44d   :  { %2655 = vtanh.f32 %v1181_v21  ;;  %v3745_v21 = vld [vmem:[#allocation9 + $0x50] sm:$0xff] }
 0x45a   :  { %v2656_v35 = vpop.eup %2655 }
 0x45b   :  { %v1184_v57 = vmul.f32 %v2656_v35, %v1183_v33  ;;  %v3759_v33 = vld [vmem:[#allocation9 + $0x30] sm:$0xff]  ;;  %v3762_v35 = vld [vmem:[#allocation9 + $0x40] sm:$0xff] }
 0x45c   :  { %4187 = vst [vmem:[#allocation27_spill] sm:$0xff] %v3759_v33  ;;  %4188 = vst [vmem:[#allocation20_spill] sm:$0xff] %v3762_v35 }
 0x45d   :  { %v1186_v59 = vadd.f32 %v1185_v25, %v1184_v57  ;;  %v3765_v57 = vld [vmem:[#allocation9 + $0x20] sm:$0xff]  ;;  %v3769_v25 = vld [vmem:[#allocation9 + $0x18] sm:$0xff] }
 0x45e   :  { %4189 = vst [vmem:[#allocation30_spill] sm:$0xff] %v3765_v57  ;;  %4190 = vst [vmem:[#allocation31_spill] sm:$0xff] %v3769_v25 }
 0x45f   :  { %v3667_v11 = vmul.f32 %v1194_v17, %v1186_v59  ;;  %v3755_v17 = vld [vmem:[#allocation9 + $0x38] sm:$0xff]  ;;  %v3775_v59 = vld [vmem:[#allocation9 + $0x8] sm:$0xff] }
 0x460   :  { %4186 = vst [vmem:[#allocation24_spill] sm:$0xff] %v3755_v17  ;;  %4192 = vst [vmem:[#allocation32_spill] sm:$0xff] %v3775_v59 }
 0x461   :  { %v3671_v13 = vadd.f32 %v1197_v12, %v3667_v11  ;;  %v3779_v12 = vld [vmem:[#allocation9] sm:$0xff] }
 0x462   :  { %4193 = vst [vmem:[#allocation33_spill] sm:$0xff] %v3779_v12 }
 0x463   :  { %1269 = vmatmul.mubr.f32.vlgmr.msra.gmra.mxu0 %v3671_v13  ;;  %2462 = vmatmul.mubr.f32.vlgmr.msra.gmra.mxu1 %v3671_v13 }
 0x464   :  { %1379 = vmatpush1.msra.mxu0 %v3533_v39  ;;  %2465 = vmatpush3.msra.mxu1 %v3676_v14 }
 0x465   :  { %1380 = vmatprep.subr.mxu0 %v3537_v40  ;;  %2466 = vmatprep.subr.mxu1 %v4150_v0 }
 0x466   :  { %1381 = vmatpush1.msra.mxu0 %v3541_v41  ;;  %2467 = vmatpush3.msra.mxu1 %v3682_v22 }
 0x467   :  { %1382 = vmatprep.subr.mxu0 %v3545_v42  ;;  %2468 = vmatprep.subr.mxu1 %v4150_v0 }
 0x468   :  { %1383 = vmatpush1.msra.mxu0 %v3549_v45  ;;  %2469 = vmatpush3.msra.mxu1 %v3688_v23 }
 0x469   :  { %1384 = vmatprep.subr.mxu0 %v3553_v60  ;;  %2470 = vmatprep.subr.mxu1 %v4150_v0 }
 0x46a   :  { %1385 = vmatpush1.msra.mxu0 %v3557_v46  ;;  %2471 = vmatpush3.msra.mxu1 %v3694_v24 }
 0x46b   :  { %1386 = vmatprep.subr.mxu0 %v3561_v3  ;;  %2472 = vmatprep.subr.mxu1 %v4150_v0 }
 0x46c   :  { %1387 = vmatpush1.msra.mxu0 %v3565_v47  ;;  %2473 = vmatpush3.msra.mxu1 %v3700_v27 }
 0x46d   :  { %1388 = vmatprep.subr.mxu0 %v3569_v4  ;;  %2474 = vmatprep.subr.mxu1 %v4150_v0 }
 0x46e   :  { %1389 = vmatpush1.msra.mxu0 %v3573_v48  ;;  %2475 = vmatpush3.msra.mxu1 %v3706_v28 }
 0x46f   :  { %1390 = vmatprep.subr.mxu0 %v3577_v5  ;;  %2476 = vmatprep.subr.mxu1 %v4150_v0 }
 0x470   :  { %1391 = vmatpush1.msra.mxu0 %v3581_v51  ;;  %2477 = vmatpush3.msra.mxu1 %v3712_v29 }
 0x471   :  { %1392 = vmatprep.subr.mxu0 %v3585_v6  ;;  %2478 = vmatprep.subr.mxu1 %v4150_v0 }
 0x472   :  { %1393 = vmatpush1.msra.mxu0 %v3589_v52  ;;  %2479 = vmatpush3.msra.mxu1 %v3718_v30 }
 0x473   :  { %1394 = vmatprep.subr.mxu0 %v3593_v7  ;;  %2480 = vmatprep.subr.mxu1 %v4150_v0 }
 0x474   :  { %1395 = vmatpush1.msra.mxu0 %v3597_v53  ;;  %2481 = vmatpush3.msra.mxu1 %v3724_v32 }
 0x475   :  { %1396 = vmatprep.subr.mxu0 %v3601_v8  ;;  %2482 = vmatprep.subr.mxu1 %v4150_v0 }
 0x476   :  { %1397 = vmatpush1.msra.mxu0 %v3605_v54  ;;  %2483 = vmatpush3.msra.mxu1 %v3730_v26 }
 0x477   :  { %1398 = vmatprep.subr.mxu0 %v3609_v9  ;;  %2484 = vmatprep.subr.mxu1 %v4150_v0 }
 0x478   :  { %1399 = vmatpush1.msra.mxu0 %v3613_v19  ;;  %2485 = vmatpush3.msra.mxu1 %v3736_v62 }
 0x479   :  { %1400 = vmatprep.subr.mxu0 %v3617_v10  ;;  %2486 = vmatprep.subr.mxu1 %v4150_v0 }
 0x47a   :  { %1401 = vmatpush1.msra.mxu0 %v3621_v61  ;;  %2487 = vmatpush3.msra.mxu1 %v3742_v15 }
 0x47b   :  { %1402 = vmatprep.subr.mxu0 %v3745_v21  ;;  %2488 = vmatprep.subr.mxu1 %v4150_v0 }
 0x47c   :  { %1403 = vmatpush1.msra.mxu0 %v3749_v38  ;;  %2489 = vmatpush3.msra.mxu1 %v3752_v20 }
 0x47d   :  { %1404 = vmatprep.subr.mxu0 %v3755_v17  ;;  %2490 = vmatprep.subr.mxu1 %v4150_v0  ;;  %v4197_v17 = vld [vmem:[#allocation45_spill] sm:$0xff] }
 0x47e   :  { %1405 = vmatpush1.msra.mxu0 %v3759_v33  ;;  %2491 = vmatpush3.msra.mxu1 %v3762_v35 }
 0x47f   :  { %1406 = vmatprep.subr.mxu0 %v3765_v57  ;;  %2492 = vmatprep.subr.mxu1 %v4150_v0 }
 0x480   :  { %1407 = vmatpush1.msra.mxu0 %v3769_v25  ;;  %2493 = vmatpush3.msra.mxu1 %v3772_v58 }
 0x481   :  { %1408 = vmatprep.subr.mxu0 %v3775_v59  ;;  %2494 = vmatprep.subr.mxu1 %v4150_v0 }
 0x482   :  { %1409 = vmatpush1.msra.mxu0 %v3779_v12  ;;  %1442 = vmatprep.mubr.f32.mxu0 %v4150_v0 }
 0x483   :  { %2495 = vmatpush3.msra.mxu1 %v3783_v37  ;;  %2496 = vmatprep.mubr.msk.f32.mxu1 %vm2908_vm1, %v4150_v0 }
 0x484   :  { %1552 = vmatprep.subr.mxu0 %v3644_v56  ;;  %2499 = vmatprep.subr.mxu1 %v4150_v0 }
 0x523   :  { %v1270_v49 = vpop.f32.mrf.mxu0  ;;  %v1341_v16 = vpop.f32.mrf.mxu1 }
 0x524   :  { %v1345_v18 = vadd.f32 %v1270_v49, %v4195_v31  ;;  %v1359_v56 = vadd.f32 %v3309_v1, %v1341_v16 }
 0x525   :  { %v2463_v34 = vpop.f32.mrf.mxu1  ;;  %v1272_v2 = vpop.f32.mrf.mxu0 }
 0x526   :  { %v2083_v36 = vmul.f32 -1.442695, %v1345_v18  ;;  %v1346_v12 = vadd.f32 %v1272_v2, %v4196_v55  ;;  %v1367_v18 = vsel %vm3320_vm5, %v3658_v44, 0.0  ;;  %v3810_v44 = vsel %vm3320_vm5, 1.0, %v4150_v0 }
 0x528   :  { %2657 = vpow2.f32 %v2083_v36  ;;  %v2084_v59 = vmul.f32 -1.442695, %v1346_v12  ;;  %v4199_v12 = vld [vmem:[#allocation27_spill] sm:$0xff] }
 0x52a   :  { %2659 = vpow2.f32 %v2084_v59 }
 0x535   :  { %v2658_v37 = vpop.eup %2657 }
 0x536   :  { %v1353_v58 = vadd.f32 1.0, %v2658_v37  ;;  %v1368_v37 = vsel %vm418_vm7, %v3655_v43, %v1367_v18  ;;  %v1200_v43 = vmul.f32 %v3810_v44, %v3671_v13  ;;  %v4201_v18 = vld [vmem:[#allocation30_spill] sm:$0xff] }
 0x537   :  { %v2660_v25 = vpop.eup %2659  ;;  %v1370_v16 = vsub.f32 1.0, %v1368_v37 }
 0x538   :  { %2661 = vrcp.f32 %v1353_v58  ;;  %v1354_v57 = vadd.f32 1.0, %v2660_v25 }
 0x53a   :  { %2663 = vrcp.f32 %v1354_v57 }
 0x545   :  { %v2662_v35 = vpop.eup %2661 }
 0x546   :  { %v1360_v33 = vmul.f32 %v2662_v35, %v1359_v56 }
 0x547   :  { %v2664_v49 = vpop.eup %2663 }
 0x548   :  { %v1361_v31 = vadd.f32 %v1360_v33, %v4197_v17  ;;  %v1363_v2 = vsub.f32 1.0, %v2664_v49  ;;  %v1365_v1 = vmul.f32 %v2664_v49, %v3671_v13  ;;  %v1371_v17 = vmul.f32 %v1370_v16, %v3671_v13  ;;  %v4202_v49 = vld [vmem:[#allocation31_spill] sm:$0xff] }
 0x549   :  { %v3805_v33 = vsel %vm418_vm7, 1.0, %v4150_v0 }
 0x54a   :  { %2665 = vtanh.f32 %v1361_v31  ;;  %v1199_v25 = vmul.f32 %v3805_v33, %v3667_v11  ;;  %v4198_v11 = vld [vmem:[#allocation24_spill] sm:$0xff] }
 0x54b   :  { %v4200_v31 = vld [vmem:[#allocation20_spill] sm:$0xff] }
 0x557   :  { %v2666_v55 = vpop.eup %2665 }
 0x558   :  { %v1364_v34 = vmul.f32 %v2666_v55, %v1363_v2  ;;  %v4204_v2 = vld [vmem:[#allocation32_spill] sm:$0xff]  ;;  %v4205_v55 = vld [vmem:[#allocation33_spill] sm:$0xff] }
 0x55a   :  { %v1366_v36 = vadd.f32 %v1365_v1, %v1364_v34  ;;  %v4206_v34 = vld [vmem:[#allocation42_spill] sm:$0xff]  ;;  %v4207_v1 = vld [vmem:[#allocation23_spill] sm:$0xff] }
 0x55c   :  { %v1369_v56 = vmul.f32 %v1368_v37, %v1366_v36  ;;  %v4203_v37 = vld [vmem:[#allocation43_spill] sm:$0xff] }
 0x55e   :  { %v3814_v35 = vadd.f32 %v1371_v17, %v1369_v56  ;;  %v1373_v57 = vmul.f32 %v3805_v33, %v1369_v56  ;;  %v4208_v56 = vld [vmem:[#allocation36_spill] sm:$0xff] }
 0x560   :  { %v1374_v58 = vmul.f32 %v3810_v44, %v3814_v35  ;;  %1443 = vmatmul.mubr.f32.vlgmr.msra.gmra.mxu0 %v3814_v35  ;;  %v1908_v59 = vadd.f32 %v1373_v57, %v1200_v43  ;;  %2497 = vmatmul.mubr.f32.vlgmr.msra.gmra.mxu1 %v3814_v35 }
 0x561   :  { %1553 = vmatpush1.msra.mxu0 %v3533_v39  ;;  %2500 = vmatpush3.msra.mxu1 %v3676_v14 }
 0x562   :  { %1910 = vst [vmem:[#allocation12 + $0x20] sm:$0xff] %v1908_v59  ;;  %1554 = vmatprep.subr.mxu0 %v3537_v40  ;;  %2501 = vmatprep.subr.mxu1 %v4150_v0  ;;  %v1905_v13 = vadd.f32 %v1374_v58, %v1199_v25  ;;  %v4209_v58 = vld [vmem:[#allocation37_spill] sm:$0xff] }
 0x563   :  { %1555 = vmatpush1.msra.mxu0 %v3541_v41  ;;  %2502 = vmatpush3.msra.mxu1 %v3682_v22 }
 0x564   :  { %1556 = vmatprep.subr.mxu0 %v3545_v42  ;;  %2503 = vmatprep.subr.mxu1 %v4150_v0  ;;  %1907 = vst [vmem:[#allocation12 + $0x18] sm:$0xff] %v1905_v13 }
 0x565   :  { %1557 = vmatpush1.msra.mxu0 %v3549_v45  ;;  %2504 = vmatpush3.msra.mxu1 %v3688_v23 }
 0x566   :  { %1558 = vmatprep.subr.mxu0 %v3553_v60  ;;  %2505 = vmatprep.subr.mxu1 %v4150_v0 }
 0x567   :  { %1559 = vmatpush1.msra.mxu0 %v3557_v46  ;;  %2506 = vmatpush3.msra.mxu1 %v3694_v24 }
 0x568   :  { %1560 = vmatprep.subr.mxu0 %v3561_v3  ;;  %2507 = vmatprep.subr.mxu1 %v4150_v0 }
 0x569   :  { %1561 = vmatpush1.msra.mxu0 %v3565_v47  ;;  %2508 = vmatpush3.msra.mxu1 %v3700_v27 }
 0x56a   :  { %1562 = vmatprep.subr.mxu0 %v3569_v4  ;;  %2509 = vmatprep.subr.mxu1 %v4150_v0 }
 0x56b   :  { %1563 = vmatpush1.msra.mxu0 %v3573_v48  ;;  %2510 = vmatpush3.msra.mxu1 %v3706_v28 }
 0x56c   :  { %1564 = vmatprep.subr.mxu0 %v3577_v5  ;;  %2511 = vmatprep.subr.mxu1 %v4150_v0 }
 0x56d   :  { %1565 = vmatpush1.msra.mxu0 %v3581_v51  ;;  %2512 = vmatpush3.msra.mxu1 %v3712_v29 }
 0x56e   :  { %1566 = vmatprep.subr.mxu0 %v3585_v6  ;;  %2513 = vmatprep.subr.mxu1 %v4150_v0 }
 0x56f   :  { %1567 = vmatpush1.msra.mxu0 %v3589_v52  ;;  %2514 = vmatpush3.msra.mxu1 %v3718_v30 }
 0x570   :  { %1568 = vmatprep.subr.mxu0 %v3593_v7  ;;  %2515 = vmatprep.subr.mxu1 %v4150_v0 }
 0x571   :  { %1569 = vmatpush1.msra.mxu0 %v3597_v53  ;;  %2516 = vmatpush3.msra.mxu1 %v3724_v32 }
 0x572   :  { %1570 = vmatprep.subr.mxu0 %v3601_v8  ;;  %2517 = vmatprep.subr.mxu1 %v4150_v0 }
 0x573   :  { %1571 = vmatpush1.msra.mxu0 %v3605_v54  ;;  %2518 = vmatpush3.msra.mxu1 %v3730_v26 }
 0x574   :  { %1572 = vmatprep.subr.mxu0 %v3609_v9  ;;  %2519 = vmatprep.subr.mxu1 %v4150_v0 }
 0x575   :  { %1573 = vmatpush1.msra.mxu0 %v3613_v19  ;;  %2520 = vmatpush3.msra.mxu1 %v3736_v62 }
 0x576   :  { %1574 = vmatprep.subr.mxu0 %v3617_v10  ;;  %2521 = vmatprep.subr.mxu1 %v4150_v0 }
 0x577   :  { %1575 = vmatpush1.msra.mxu0 %v3621_v61  ;;  %2522 = vmatpush3.msra.mxu1 %v3742_v15 }
 0x578   :  { %1576 = vmatprep.subr.mxu0 %v3745_v21  ;;  %2523 = vmatprep.subr.mxu1 %v4150_v0 }
 0x579   :  { %1577 = vmatpush1.msra.mxu0 %v3749_v38  ;;  %2524 = vmatpush3.msra.mxu1 %v3752_v20 }
 0x57a   :  { %1578 = vmatprep.subr.mxu0 %v4198_v11  ;;  %2525 = vmatprep.subr.mxu1 %v4150_v0 }
 0x57b   :  { %1579 = vmatpush1.msra.mxu0 %v4199_v12  ;;  %2526 = vmatpush3.msra.mxu1 %v4200_v31 }
 0x57c   :  { %1580 = vmatprep.subr.mxu0 %v4201_v18  ;;  %2527 = vmatprep.subr.mxu1 %v4150_v0 }
 0x57d   :  { %1581 = vmatpush1.msra.mxu0 %v4202_v49  ;;  %2528 = vmatpush3.msra.mxu1 %v4203_v37 }
 0x57e   :  { %1582 = vmatprep.subr.mxu0 %v4204_v2  ;;  %2529 = vmatprep.subr.mxu1 %v4150_v0 }
 0x57f   :  { %1583 = vmatpush1.msra.mxu0 %v4205_v55  ;;  %1616 = vmatprep.mubr.f32.mxu0 %v4150_v0 }
 0x580   :  { %2530 = vmatpush3.msra.mxu1 %v4206_v34  ;;  %2531 = vmatprep.mubr.msk.f32.mxu1 %vm2908_vm1, %v4150_v0 }
 0x581   :  { %1726 = vmatprep.subr.mxu0 %v4207_v1  ;;  %2534 = vmatprep.subr.mxu1 %v4150_v0  ;;  %v3895_v1 = vld [vmem:[%s4059_s5] ss:$0 sm:$0xff]  ;;  %s2909_s5 = smov [#allocation12]  }
 0x582   :  { %4210 = vst [vmem:[#allocation34_spill] sm:$0xff] %v3895_v1  ;;  %s2020_s17 = sshll.u32 %s2909_s5, 4  ;;  %s2021_s17 = int_to_ptr.vmem [resolvable:$true] %s2020_s17 }
 0x583   :  { %s2848_s18 = scalar_lea.vmem %s2021_s17, 1024  ;;  %p2853_p12 = scmp.lt.s32.totalorder %s2021_s17, %s2021_s17 }
 0x584   :  { %p2849_p11 = scmp.ne.s32.totalorder %s2021_s17, %s2848_s18  ;;  %p2854_p13 = scmp.lt.s32.totalorder %s2848_s18, %s2848_s18 }
 0x586   :  { %p2855_p0 = por %p2854_p13, %p2853_p12 }
 0x588   :  { %p2856_p1 = pnand %p2855_p0, %p2849_p11 }
 0x620   :  { %v1444_v16 = vpop.f32.mrf.mxu0  ;;  %v1515_v36 = vpop.f32.mrf.mxu1 }
 0x621   :  { %v1519_v17 = vadd.f32 %v1444_v16, %v4208_v56  ;;  %v1533_v16 = vadd.f32 %v3895_v1, %v1515_v36 }
 0x622   :  { %v2498_v43 = vpop.f32.mrf.mxu1  ;;  %v1446_v25 = vpop.f32.mrf.mxu0 }
 0x623   :  { %v2085_v57 = vmul.f32 -1.442695, %v1519_v17  ;;  %v1520_v59 = vadd.f32 %v1446_v25, %v4209_v58  ;;  %v4211_v43 = vld [vmem:[#allocation44_spill] sm:$0xff]  ;;  %v4212_v25 = vld [vmem:[#allocation21_spill] sm:$0xff] }
 0x624   :  { %v4213_v58 = vld [vmem:[#allocation25_spill] sm:$0xff] }
 0x625   :  { %2667 = vpow2.f32 %v2085_v57  ;;  %v2086_v13 = vmul.f32 -1.442695, %v1520_v59 }
 0x627   :  { %2669 = vpow2.f32 %v2086_v13 }
 0x632   :  { %v2668_v34 = vpop.eup %2667 }
 0x633   :  { %v1527_v55 = vadd.f32 1.0, %v2668_v34  ;;  %v1541_v34 = vsel %vm3320_vm5, %v4212_v25, 0.0 }
 0x634   :  { %v2670_v2 = vpop.eup %2669 }
 0x635   :  { %2671 = vrcp.f32 %v1527_v55  ;;  %v1528_v37 = vadd.f32 1.0, %v2670_v2  ;;  %v1542_v2 = vsel %vm418_vm7, %v4213_v58, %v1541_v34  ;;  %v1019_v34 = vmul.f32 %v3805_v33, %v4215_v63  ;;  %v4216_v63 = vld [vmem:[#allocation31_spill] sm:$0xff] }
 0x636   :  { %v1544_v1 = vsub.f32 1.0, %v1542_v2 }
 0x637   :  { %2673 = vrcp.f32 %v1528_v37 }
 0x642   :  { %v2672_v56 = vpop.eup %2671 }
 0x643   :  { %v1534_v17 = vmul.f32 %v2672_v56, %v1533_v16  ;;  %v1545_v56 = vmul.f32 %v1544_v1, %v3814_v35 }
 0x644   :  { %v2674_v55 = vpop.eup %2673 }
 0x645   :  { %v1535_v57 = vadd.f32 %v1534_v17, %v4211_v43  ;;  %v1537_v59 = vsub.f32 1.0, %v2674_v55  ;;  %v1539_v36 = vmul.f32 %v2674_v55, %v3814_v35  ;;  %v4214_v17 = vld [vmem:[#allocation26_spill] sm:$0xff] }
 0x646   :  { %v1020_v43 = vmul.f32 %v3810_v44, %v4214_v17  ;;  %v1931_v17 = vld [vmem:[#allocation11 + $0x58] sm:$0xff] }
 0x647   :  { %2675 = vtanh.f32 %v1535_v57 }
 0x654   :  { %v2676_v13 = vpop.eup %2675 }
 0x655   :  { %v1538_v49 = vmul.f32 %v2676_v13, %v1537_v59 }
 0x657   :  { %v1540_v16 = vadd.f32 %v1539_v36, %v1538_v49  ;;  %v4229_v49 = vld [vmem:[#allocation53_spill] sm:$0xff]  ;;  %v1935_v36 = vld [vmem:[#allocation11 + $0x78] sm:$0xff] }
 0x658   :  { %v839_v1 = vmul.f32 %v3805_v33, %v4229_v49 }
 0x659   :  { %v1543_v37 = vmul.f32 %v1542_v2, %v1540_v16  ;;  %v1934_v16 = vld [vmem:[#allocation11 + $0x70] sm:$0xff] }
 0x65b   :  { %v3909_v57 = vadd.f32 %v1545_v56, %v1543_v37  ;;  %v1547_v25 = vmul.f32 %v3805_v33, %v1543_v37  ;;  %v1933_v37 = vld [vmem:[#allocation11 + $0x68] sm:$0xff]  ;;  %v1932_v56 = vld [vmem:[#allocation11 + $0x60] sm:$0xff] }
 0x65d   :  { %v1548_v58 = vmul.f32 %v3810_v44, %v3909_v57  ;;  %1617 = vmatmul.mubr.f32.vlgmr.msra.gmra.mxu0 %v3909_v57  ;;  %v1911_v55 = vadd.f32 %v1547_v25, %v1020_v43  ;;  %2532 = vmatmul.mubr.f32.vlgmr.msra.gmra.mxu1 %v3909_v57  ;;  %v1930_v43 = vld [vmem:[#allocation11 + $0x50] sm:$0xff]  ;;  %v1928_v25 = vld [vmem:[#allocation11 + $0x40] sm:$0xff] }
 0x65e   :  { %1727 = vmatpush1.msra.mxu0 %v3533_v39  ;;  %2535 = vmatpush3.msra.mxu1 %v3676_v14  ;;  %v4217_v39 = vld [vmem:[#allocation43_spill] sm:$0xff] }
 0x65f   :  { %1913 = vst [vmem:[#allocation12 + $0x28] sm:$0xff] %v1911_v55  ;;  %1728 = vmatprep.subr.mxu0 %v3537_v40  ;;  %2536 = vmatprep.subr.mxu1 %v4150_v0  ;;  %v1902_v35 = vadd.f32 %v1548_v58, %v1019_v34  ;;  %v4218_v40 = vld [vmem:[#allocation32_spill] sm:$0xff]  ;;  %v1927_v34 = vld [vmem:[#allocation11 + $0x38] sm:$0xff]  ;;  %v1926_v58 = vld [vmem:[#allocation11 + $0x30] sm:$0xff] }
 0x660   :  { %1729 = vmatpush1.msra.mxu0 %v3541_v41  ;;  %2537 = vmatpush3.msra.mxu1 %v3682_v22  ;;  %v4219_v41 = vld [vmem:[#allocation33_spill] sm:$0xff]  ;;  %v1925_v55 = vld [vmem:[#allocation11 + $0x28] sm:$0xff] }
 0x661   :  { %1730 = vmatprep.subr.mxu0 %v3545_v42  ;;  %2538 = vmatprep.subr.mxu1 %v4150_v0  ;;  %1904 = vst [vmem:[#allocation12 + $0x10] sm:$0xff] %v1902_v35  ;;  %v4220_v42 = vld [vmem:[#allocation42_spill] sm:$0xff]  ;;  %v4225_v22 = vld [vmem:[#allocation29_spill] sm:$0xff]  ;;  %v1924_v35 = vld [vmem:[#allocation11 + $0x20] sm:$0xff] }
 0x662   :  { %1731 = vmatpush1.msra.mxu0 %v3549_v45  ;;  %2539 = vmatpush3.msra.mxu1 %v3688_v23 }
 0x663   :  { %1732 = vmatprep.subr.mxu0 %v3553_v60  ;;  %2540 = vmatprep.subr.mxu1 %v4150_v0 }
 0x664   :  { %1733 = vmatpush1.msra.mxu0 %v3557_v46  ;;  %2541 = vmatpush3.msra.mxu1 %v3694_v24  ;;  %v4221_v46 = vld [vmem:[#allocation38_spill] sm:$0xff]  ;;  %v1715_v24 = vsel %vm3320_vm5, %v4225_v22, 0.0 }
 0x665   :  { %1734 = vmatprep.subr.mxu0 %v3561_v3  ;;  %2542 = vmatprep.subr.mxu1 %v4150_v0 }
 0x666   :  { %1735 = vmatpush1.msra.mxu0 %v3565_v47  ;;  %2543 = vmatpush3.msra.mxu1 %v3700_v27 }
 0x667   :  { %1736 = vmatprep.subr.mxu0 %v3569_v4  ;;  %2544 = vmatprep.subr.mxu1 %v4150_v0 }
 0x668   :  { %1737 = vmatpush1.msra.mxu0 %v3573_v48  ;;  %2545 = vmatpush3.msra.mxu1 %v3706_v28  ;;  %v4227_v28 = vld [vmem:[#allocation28_spill] sm:$0xff] }
 0x669   :  { %1738 = vmatprep.subr.mxu0 %v3577_v5  ;;  %2546 = vmatprep.subr.mxu1 %v4150_v0  ;;  %v4222_v5 = vld [vmem:[#allocation39_spill] sm:$0xff] }
 0x66a   :  { %1739 = vmatpush1.msra.mxu0 %v3581_v51  ;;  %2547 = vmatpush3.msra.mxu1 %v3712_v29  ;;  %v1716_v29 = vsel %vm418_vm7, %v4227_v28, %v1715_v24  ;;  %v4234_v24 = vld [vmem:[#allocation49_spill] sm:$0xff] }
 0x66b   :  { %1740 = vmatprep.subr.mxu0 %v3585_v6  ;;  %2548 = vmatprep.subr.mxu1 %v4150_v0 }
 0x66c   :  { %1741 = vmatpush1.msra.mxu0 %v3589_v52  ;;  %2549 = vmatpush3.msra.mxu1 %v3718_v30 }
 0x66d   :  { %1742 = vmatprep.subr.mxu0 %v3593_v7  ;;  %2550 = vmatprep.subr.mxu1 %v4150_v0 }
 0x66e   :  { %1743 = vmatpush1.msra.mxu0 %v3597_v53  ;;  %2551 = vmatpush3.msra.mxu1 %v3724_v32 }
 0x66f   :  { %1744 = vmatprep.subr.mxu0 %v3601_v8  ;;  %2552 = vmatprep.subr.mxu1 %v4150_v0 }
 0x670   :  { %1745 = vmatpush1.msra.mxu0 %v3605_v54  ;;  %2553 = vmatpush3.msra.mxu1 %v3730_v26  ;;  %v4223_v54 = vld [vmem:[#allocation34_spill] sm:$0xff] }
 0x671   :  { %1746 = vmatprep.subr.mxu0 %v3609_v9  ;;  %2554 = vmatprep.subr.mxu1 %v4150_v0 }
 0x672   :  { %1747 = vmatpush1.msra.mxu0 %v3613_v19  ;;  %2555 = vmatpush3.msra.mxu1 %v3736_v62 }
 0x673   :  { %1748 = vmatprep.subr.mxu0 %v3617_v10  ;;  %2556 = vmatprep.subr.mxu1 %v4150_v0 }
 0x674   :  { %1749 = vmatpush1.msra.mxu0 %v3621_v61  ;;  %2557 = vmatpush3.msra.mxu1 %v3742_v15  ;;  %v4224_v61 = vld [vmem:[#allocation47_spill] sm:$0xff]  ;;  %v1718_v15 = vsub.f32 1.0, %v1716_v29 }
 0x675   :  { %1750 = vmatprep.subr.mxu0 %v3745_v21  ;;  %2558 = vmatprep.subr.mxu1 %v4150_v0 }
 0x676   :  { %1751 = vmatpush1.msra.mxu0 %v3749_v38  ;;  %2559 = vmatpush3.msra.mxu1 %v3752_v20  ;;  %v1719_v20 = vmul.f32 %v1718_v15, %v3909_v57 }
 0x677   :  { %1752 = vmatprep.subr.mxu0 %v4198_v11  ;;  %2560 = vmatprep.subr.mxu1 %v4150_v0  ;;  %v4228_v11 = vld [vmem:[#allocation54_spill] sm:$0xff] }
 0x678   :  { %1753 = vmatpush1.msra.mxu0 %v4199_v12  ;;  %2561 = vmatpush3.msra.mxu1 %v4200_v31  ;;  %v840_v12 = vmul.f32 %v3810_v44, %v4228_v11  ;;  %v4236_v11 = vld [vmem:[#allocation51_spill] sm:$0xff] }
 0x679   :  { %1754 = vmatprep.subr.mxu0 %v4201_v18  ;;  %2562 = vmatprep.subr.mxu1 %v4150_v0  ;;  %v659_v50 = vmul.f32 %v3805_v33, %v4236_v11 }
 0x67a   :  { %1755 = vmatpush1.msra.mxu0 %v4216_v63  ;;  %2563 = vmatpush3.msra.mxu1 %v4217_v39  ;;  %v1923_v63 = vld [vmem:[#allocation11 + $0x18] sm:$0xff]  ;;  %v1922_v39 = vld [vmem:[#allocation11 + $0x10] sm:$0xff] }
 0x67b   :  { %1756 = vmatprep.subr.mxu0 %v4218_v40  ;;  %2564 = vmatprep.subr.mxu1 %v4150_v0  ;;  %v1921_v40 = vld [vmem:[#allocation11 + $0x8] sm:$0xff] }
 0x67c   :  { %1757 = vmatpush1.msra.mxu0 %v4219_v41  ;;  %1790 = vmatprep.mubr.f32.mxu0 %v4150_v0  ;;  %v1920_v41 = vld [vmem:[#allocation11] sm:$0xff] }
 0x67d   :  { %2565 = vmatpush3.msra.mxu1 %v4220_v42  ;;  %2566 = vmatprep.mubr.msk.f32.mxu1 %vm2908_vm1, %v4150_v0 }
 0x67e   :  { %2569 = vmatprep.subr.mxu0 %v4150_v0 }
 0x71d   :  { %v1618_v45 = vpop.f32.mrf.mxu0  ;;  %v1689_v60 = vpop.f32.mrf.mxu1 }
 0x71e   :  { %v1693_v3 = vadd.f32 %v1618_v45, %v4221_v46  ;;  %v1707_v9 = vadd.f32 %v4223_v54, %v1689_v60  ;;  %v4230_v60 = vld [vmem:[#allocation40_spill] sm:$0xff] }
 0x71f   :  { %v2533_v47 = vpop.f32.mrf.mxu1  ;;  %v1620_v48 = vpop.f32.mrf.mxu0 }
 0x720   :  { %v2087_v4 = vmul.f32 -1.442695, %v1693_v3  ;;  %v1694_v51 = vadd.f32 %v1620_v48, %v4222_v5  ;;  %v4231_v48 = vld [vmem:[#allocation41_spill] sm:$0xff] }
 0x722   :  { %2677 = vpow2.f32 %v2087_v4  ;;  %v2088_v6 = vmul.f32 -1.442695, %v1694_v51 }
 0x724   :  { %2679 = vpow2.f32 %v2088_v6 }
 0x72f   :  { %v2678_v52 = vpop.eup %2677 }
 0x730   :  { %v1701_v7 = vadd.f32 1.0, %v2678_v52 }
 0x731   :  { %v2680_v53 = vpop.eup %2679 }
 0x732   :  { %2681 = vrcp.f32 %v1701_v7  ;;  %v1702_v8 = vadd.f32 1.0, %v2680_v53 }
 0x734   :  { %2683 = vrcp.f32 %v1702_v8 }
 0x73f   :  { %v2682_v19 = vpop.eup %2681 }
 0x740   :  { %v1708_v10 = vmul.f32 %v2682_v19, %v1707_v9  ;;  %v4232_v19 = vld [vmem:[#allocation46_spill] sm:$0xff] }
 0x741   :  { %v2684_v27 = vpop.eup %2683 }
 0x742   :  { %v1709_v14 = vadd.f32 %v1708_v10, %v4224_v61  ;;  %v1711_v30 = vsub.f32 1.0, %v2684_v27  ;;  %v1713_v62 = vmul.f32 %v2684_v27, %v3909_v57  ;;  %v1929_v57 = vld [vmem:[#allocation11 + $0x48] sm:$0xff]  ;;  %v4233_v61 = vld [vmem:[#allocation50_spill] sm:$0xff] }
 0x744   :  { %2685 = vtanh.f32 %v1709_v14  ;;  %v1889_v14 = vsel %vm3320_vm5, %v4233_v61, 0.0 }
 0x745   :  { %v1890_v27 = vsel %vm418_vm7, %v4234_v24, %v1889_v14 }
 0x751   :  { %v2686_v32 = vpop.eup %2685 }
 0x752   :  { %v1712_v26 = vmul.f32 %v2686_v32, %v1711_v30  ;;  %v1892_v32 = vsub.f32 1.0, %v1890_v27 }
 0x754   :  { %v1714_v21 = vadd.f32 %v1713_v62, %v1712_v26 }
 0x756   :  { %v1717_v38 = vmul.f32 %v1716_v29, %v1714_v21  ;;  %v4235_v21 = vld [vmem:[#allocation52_spill] sm:$0xff] }
 0x758   :  { %v3998_v31 = vadd.f32 %v1719_v20, %v1717_v38  ;;  %v1721_v18 = vmul.f32 %v3805_v33, %v1717_v38  ;;  %v660_v38 = vmul.f32 %v3810_v44, %v4235_v21 }
 0x75a   :  { %v1722_v2 = vmul.f32 %v3810_v44, %v3998_v31  ;;  %1791 = vmatmul.mubr.f32.vlgmr.msra.gmra.mxu0 %v3998_v31  ;;  %v1914_v59 = vadd.f32 %v1721_v18, %v840_v12  ;;  %2567 = vmatmul.mubr.f32.vlgmr.msra.gmra.mxu1 %v3998_v31  ;;  %v1893_v15 = vmul.f32 %v1892_v32, %v3998_v31 }
 0x75b   :  { %2601 = vmatprep.mubr.msk.f32.mxu0 %vm2908_vm1, %v4150_v0  ;;  %2570 = vmatpush3.msra.mxu0 %v1935_v36 }
 0x75c   :  { %1916 = vst [vmem:[#allocation12 + $0x30] sm:$0xff] %v1914_v59  ;;  %v1899_v13 = vadd.f32 %v1722_v2, %v839_v1  ;;  %2571 = vmatprep.subr.mxu0 %v4150_v0 }
 0x75d   :  { %2572 = vmatpush3.msra.mxu0 %v1934_v16 }
 0x75e   :  { %1901 = vst [vmem:[#allocation12 + $0x8] sm:$0xff] %v1899_v13  ;;  %2573 = vmatprep.subr.mxu0 %v4150_v0 }
 0x75f   :  { %2574 = vmatpush3.msra.mxu0 %v1933_v37 }
 0x760   :  { %2575 = vmatprep.subr.mxu0 %v4150_v0 }
 0x761   :  { %2576 = vmatpush3.msra.mxu0 %v1932_v56 }
 0x762   :  { %2577 = vmatprep.subr.mxu0 %v4150_v0 }
 0x763   :  { %2578 = vmatpush3.msra.mxu0 %v1931_v17 }
 0x764   :  { %2579 = vmatprep.subr.mxu0 %v4150_v0 }
 0x765   :  { %2580 = vmatpush3.msra.mxu0 %v1930_v43 }
 0x766   :  { %2581 = vmatprep.subr.mxu0 %v4150_v0 }
 0x767   :  { %2582 = vmatpush3.msra.mxu0 %v1929_v57 }
 0x768   :  { %2583 = vmatprep.subr.mxu0 %v4150_v0 }
 0x769   :  { %2584 = vmatpush3.msra.mxu0 %v1928_v25 }
 0x76a   :  { %2585 = vmatprep.subr.mxu0 %v4150_v0 }
 0x76b   :  { %2586 = vmatpush3.msra.mxu0 %v1927_v34 }
 0x76c   :  { %2587 = vmatprep.subr.mxu0 %v4150_v0 }
 0x76d   :  { %2588 = vmatpush3.msra.mxu0 %v1926_v58 }
 0x76e   :  { %2589 = vmatprep.subr.mxu0 %v4150_v0 }
 0x76f   :  { %2590 = vmatpush3.msra.mxu0 %v1925_v55 }
 0x770   :  { %2591 = vmatprep.subr.mxu0 %v4150_v0 }
 0x771   :  { %2592 = vmatpush3.msra.mxu0 %v1924_v35 }
 0x772   :  { %2593 = vmatprep.subr.mxu0 %v4150_v0 }
 0x773   :  { %2594 = vmatpush3.msra.mxu0 %v1923_v63 }
 0x774   :  { %2595 = vmatprep.subr.mxu0 %v4150_v0 }
 0x775   :  { %2596 = vmatpush3.msra.mxu0 %v1922_v39 }
 0x776   :  { %2597 = vmatprep.subr.mxu0 %v4150_v0 }
 0x777   :  { %2598 = vmatpush3.msra.mxu0 %v1921_v40 }
 0x778   :  { %2599 = vmatprep.subr.mxu0 %v4150_v0 }
 0x779   :  { %2600 = vmatpush3.msra.mxu0 %v1920_v41 }
 0x81a   :  { %v1792_v42 = vpop.f32.mrf.mxu0  ;;  %v1863_v45 = vpop.f32.mrf.mxu1 }
 0x81b   :  { %v1867_v46 = vadd.f32 %v1792_v42, %v4230_v60  ;;  %v1881_v0 = vadd.f32 %v4223_v54, %v1863_v45 }
 0x81c   :  { %v2568_v3 = vpop.f32.mrf.mxu1  ;;  %v1794_v4 = vpop.f32.mrf.mxu0 }
 0x81d   :  { %v2089_v47 = vmul.f32 -1.442695, %v1867_v46  ;;  %v1868_v5 = vadd.f32 %v1794_v4, %v4231_v48 }
 0x81f   :  { %2687 = vpow2.f32 %v2089_v47  ;;  %v2090_v51 = vmul.f32 -1.442695, %v1868_v5 }
 0x821   :  { %2689 = vpow2.f32 %v2090_v51 }
 0x82c   :  { %v2688_v6 = vpop.eup %2687 }
 0x82d   :  { %v1875_v52 = vadd.f32 1.0, %v2688_v6 }
 0x82e   :  { %v2690_v7 = vpop.eup %2689 }
 0x82f   :  { %2691 = vrcp.f32 %v1875_v52  ;;  %v1876_v53 = vadd.f32 1.0, %v2690_v7 }
 0x831   :  { %2693 = vrcp.f32 %v1876_v53 }
 0x83c   :  { %v2692_v8 = vpop.eup %2691 }
 0x83d   :  { %v1882_v9 = vmul.f32 %v2692_v8, %v1881_v0 }
 0x83e   :  { %v2694_v22 = vpop.eup %2693 }
 0x83f   :  { %v1883_v10 = vadd.f32 %v1882_v9, %v4232_v19  ;;  %v1885_v28 = vsub.f32 1.0, %v2694_v22  ;;  %v1887_v54 = vmul.f32 %v2694_v22, %v3998_v31 }
 0x841   :  { %2695 = vtanh.f32 %v1883_v10 }
 0x84e   :  { %v2696_v29 = vpop.eup %2695 }
 0x84f   :  { %v1886_v30 = vmul.f32 %v2696_v29, %v1885_v28 }
 0x851   :  { %v1888_v26 = vadd.f32 %v1887_v54, %v1886_v30 }
 0x853   :  { %v1891_v62 = vmul.f32 %v1890_v27, %v1888_v26 }
 0x855   :  { %v1894_v23 = vadd.f32 %v1893_v15, %v1891_v62  ;;  %v1895_v20 = vmul.f32 %v3805_v33, %v1891_v62 }
 0x857   :  { %v1896_v12 = vmul.f32 %v3810_v44, %v1894_v23  ;;  %v1917_v18 = vadd.f32 %v1895_v20, %v660_v38  ;;  %2602 = vmatmul.mubr.f32.vlgmr.msra.gmra.mxu0 %v1894_v23 }
 0x859   :  { %v1897_v49 = vadd.f32 %v1896_v12, %v659_v50  ;;  %1919 = vst [vmem:[#allocation12 + $0x38] sm:$0xff] %v1917_v18 }
 0x85b   :  { %1898 = vst [vmem:[#allocation12] sm:$0xff] %v1897_v49 }
 0x85c   :  { %2859 = shalt.err (!%p2856_p1)
}
 0x85d   :  { %2026 = dma.vmem_to_hbm [thread:$0]  %s2021_s17, 1024, %s4062_s8, [#allocation5], %s2903_s23, %s2903_s23, %s2904_s24  }
 0x85e   :  { %v2091_v33 = vld [vmem:[%s4061_s7] ss:$0 sm:$0xff]  ;;  %s2910_s1 = smov [#allocation13]  }
 0x85f   :  { %s2033_s25 = sshll.u32 %s2910_s1, 4  ;;  %s2034_s25 = int_to_ptr.vmem [resolvable:$true] %s2033_s25 }
 0x860   :  { %s2868_s26 = scalar_lea.vmem %s2034_s25, 128  ;;  %p2873_p3 = scmp.lt.s32.totalorder %s2034_s25, %s2034_s25 }
 0x861   :  { %p2869_p2 = scmp.ne.s32.totalorder %s2034_s25, %s2868_s26  ;;  %p2874_p4 = scmp.lt.s32.totalorder %s2868_s26, %s2868_s26 }
 0x863   :  { %p2875_p5 = por %p2874_p4, %p2873_p3 }
 0x865   :  { %p2876_p6 = pnand %p2875_p5, %p2869_p2 }
 0x917   :  { %v2009_v44 = vpop.f32.mrf.mxu0 }
 0x918   :  { %v2010_v31 = vadd.f32 %v2091_v33, %v2009_v44 }
 0x919   :  { %v2603_v1 = vpop.f32.mrf.mxu0 }
 0x91a   :  { %2697 = vtanh.f32 %v2010_v31 }
 0x927   :  { %v2698_v2 = vpop.eup %2697 }
 0x928   :  { %2014 = vst [vmem:[#allocation13] sm:$0xff] %v2698_v2 }
 0x929   :  { %2879 = shalt.err (!%p2876_p6)
}
 0x92a   :  { %2036 = dma.vmem_to_hbm [thread:$0]  %s2034_s25, 128, %s4063_s9, [#allocation14]  }
 0x92b   :  { %2894 = dma.done.wait [#allocation5], 1024  }
 0x92c   :  { %2895 = vsyncadd [#allocation5], 4294966272 }
 0x92d   :  { %2896 = dma.done.wait [#allocation14], 128  }
 0x92e   :  { %2897 = vsyncadd [#allocation14], 4294967168 }
 0x92f   :  { %2043 = vsyncpa [#allocation4], 1 }
 0x930   :  { %2044 = vsyncpa [#allocation7], 1 }
 0x931   :  { %2045 = vsyncpa [#allocation10], 1 }
 0x932   :  { %2046 = vsyncpa [#allocation5], 1 }
 0x933   :  { %2047 = vsyncpa [#allocation14], 1 }

</bundles_post_ra>
